<compile_context>
chip_gen: v5e
topology: v5e:2x2
jax: 0.10.0
libtpu: 0.0.40
codegen_flags: <defaults>
</compile_context>

<pallas_src>
import jax
import jax.numpy as jnp
from jax import lax
from jax.experimental import pallas as pl
from jax.experimental.pallas import tpu as pltpu


# ------------------------------ fused kernel --------------------------------

def _disc_kernel(pp_ref, w1_ref, b1_ref, w2_ref, b2_ref,
                 wf1_ref, bf1_ref, wf2_ref, bf2_ref, o_ref,
                 p1_ref, h2_ref):
    """One image per grid step.

    pp_ref : (4, 100, 75)  conv1 im2col patches, pre-sorted (in the wrapper)
                           into the four 2x2-pool parity blocks; row = yo*10+xo.
    p1_ref : (100, 6)      scratch: pooled conv1 map, row r = yo*10 + xo.
    h2_ref : (56, 12)      scratch: conv2 output, row r = 10*y2 + x2
                           (rows with x2 >= 6 are garbage and never read).
    """
    # ---- conv1 + bias + relu + 2x2 maxpool: 4 matmuls + elementwise maxes ----
    w1 = w1_ref[...]                                              # (75, 6)
    m = jnp.dot(pp_ref[0], w1, preferred_element_type=jnp.float32)
    for t in range(1, 4):
        m = jnp.maximum(m, jnp.dot(pp_ref[t], w1,
                                   preferred_element_type=jnp.float32))
    p1_ref[...] = jnp.maximum(m + b1_ref[...], 0.0)               # (100, 6)

    # ---- conv2 (5x5, 6->12) as 25 shift-and-matmul taps (register accum) ----
    h2 = jnp.zeros((56, 12), jnp.float32)
    for dy in range(5):
        for dx in range(5):
            s = 10 * dy + dx
            h2 = h2 + jnp.dot(p1_ref[s:s + 56, :], w2_ref[5 * dy + dx],
                              preferred_element_type=jnp.float32)
    h2_ref[...] = h2

    # ---- maxpool2 + bias + relu fused with fc1 as 9 row-contractions --------
    b2 = b2_ref[...]                                              # (1, 12)
    acc = jnp.zeros((1, 32), jnp.float32)
    for q in range(9):
        base = 20 * (q // 3) + 2 * (q % 3)
        v = jnp.maximum(h2_ref[base:base + 2, :],
                        h2_ref[base + 10:base + 12, :])           # (2, 12)
        m2 = jnp.maximum(v[0:1, :], v[1:2, :])                    # (1, 12)
        m2 = jnp.maximum(m2 + b2, 0.0)                            # bias+relu commute with max
        acc = acc + jnp.dot(m2, wf1_ref[q],
                            preferred_element_type=jnp.float32)   # (1, 32)

    # ---- fc1 relu, fc2 + numerically stable sigmoid -------------------------
    y1 = jnp.maximum(acc + bf1_ref[...], 0.0)                     # (1, 32)
    z = jnp.sum(y1 * wf2_ref[...], axis=-1, keepdims=True) + bf2_ref[...]
    e = jnp.exp(-jnp.abs(z))
    o_ref[0, :, :] = jnp.where(z >= 0.0, 1.0 / (1.0 + e), e / (1.0 + e))


# -------------------------------- wrapper ------------------------------------

def discriminator_forward(params, x_nchw):
    B, C, H, W = x_nchw.shape
    assert (C, H, W) == (3, 24, 24), (C, H, W)

    # conv1 im2col in the wrapper (cheap XLA slicing of the tiny input).
    # K ordering is (dy, dx, cin), matching params["w1"] (HWIO) reshaped below.
    xhw = jnp.transpose(x_nchw, (0, 2, 3, 1))                     # (B, 24, 24, 3)
    taps = [xhw[:, dy:dy + 20, dx:dx + 20, :]
            for dy in range(5) for dx in range(5)]
    patches = jnp.concatenate(taps, axis=-1)                      # (B, 20, 20, 75)
    # Reorder conv1-output rows into the four 2x2-pool parity blocks
    # t = 2*(y % 2) + (x % 2); within a block rows are r = yo*10 + xo.
    patches = patches.reshape(B, 10, 2, 10, 2, 75)
    patches = jnp.transpose(patches, (0, 2, 4, 1, 3, 5)).reshape(B * 4, 100, 75)

    # Weight layouts matching the kernel's patch / flatten ordering.
    w1 = params["w1"].reshape(75, 6)                      # (kh*kw*cin, cout)
    w2 = params["w2"].reshape(25, 6, 12)                  # (tap, cin, cout)
    wf1 = (params["wfc1"].reshape(12, 3, 3, 32)           # rows (c, h, w) ->
           .transpose(1, 2, 0, 3).reshape(9, 12, 32))     # (h*3+w, c, out)
    b1 = params["b1"].reshape(1, 6)
    b2 = params["b2"].reshape(1, 12)
    bf1 = params["bfc1"].reshape(1, 32)
    wf2 = params["wfc2"].reshape(1, 32)
    bf2 = params["bfc2"].reshape(1, 1)

    out = pl.pallas_call(
        _disc_kernel,
        out_shape=jax.ShapeDtypeStruct((B, 1, 1), jnp.float32),
        grid=(B,),
        in_specs=[
            pl.BlockSpec((4, 100, 75), lambda i: (i, 0, 0)),   # per-image patches
            pl.BlockSpec((75, 6), lambda i: (0, 0)),           # weights stay resident
            pl.BlockSpec((1, 6), lambda i: (0, 0)),
            pl.BlockSpec((25, 6, 12), lambda i: (0, 0, 0)),
            pl.BlockSpec((1, 12), lambda i: (0, 0)),
            pl.BlockSpec((9, 12, 32), lambda i: (0, 0, 0)),
            pl.BlockSpec((1, 32), lambda i: (0, 0)),
            pl.BlockSpec((1, 32), lambda i: (0, 0)),
            pl.BlockSpec((1, 1), lambda i: (0, 0)),
        ],
        out_specs=pl.BlockSpec((1, 1, 1), lambda i: (i, 0, 0)),
        scratch_shapes=[
            pltpu.VMEM((100, 6), jnp.float32),   # pooled conv1 map
            pltpu.VMEM((56, 12), jnp.float32),   # conv2 output rows
        ],
        compiler_params=pltpu.CompilerParams(
            dimension_semantics=("parallel",),
            vmem_limit_bytes=16 * 1024 * 1024,   # padded per-step use is < 1 MiB
        ),
    )(patches, w1, b1, w2, b2, wf1, bf1, wf2, bf2)
    return out.reshape(B, 1)


# --------------------------- deterministic init ------------------------------

def init_params(key):
    ks = jax.random.split(key, 8)

    def u(k, shape, fan_in):
        bound = 1.0 / jnp.sqrt(jnp.float32(fan_in))
        return jax.random.uniform(k, shape, jnp.float32, -bound, bound)

    return dict(
        w1=u(ks[0], (5, 5, 3, 6), 3 * 25),     # HWIO
        b1=u(ks[1], (6,), 3 * 25),
        w2=u(ks[2], (5, 5, 6, 12), 6 * 25),
        b2=u(ks[3], (12,), 6 * 25),
        wfc1=u(ks[4], (12 * 3 * 3, 32), 12 * 3 * 3),   # rows in (c, h, w) order
        bfc1=u(ks[5], (32,), 12 * 3 * 3),
        wfc2=u(ks[6], (32, 1), 32),
        bfc2=u(ks[7], (1,), 32),
    )


# -------------------------------- reference ----------------------------------

def reference_forward(params, x):
    """Pure-JAX mirror of the PyTorch forward (NCHW, OIHW)."""
    w1 = jnp.transpose(params["w1"], (3, 2, 0, 1))
    w2 = jnp.transpose(params["w2"], (3, 2, 0, 1))

    def conv(x, w, b):
        y = lax.conv_general_dilated(x, w, (1, 1), "VALID",
                                     dimension_numbers=("NCHW", "OIHW", "NCHW"))
        return y + b[None, :, None, None]

    def pool(x):
        return lax.reduce_window(x, -jnp.inf, lax.max,
                                 (1, 1, 2, 2), (1, 1, 2, 2), "VALID")

    h = pool(jnp.maximum(conv(x, w1, params["b1"]), 0.0))
    h = pool(jnp.maximum(conv(h, w2, params["b2"]), 0.0))
    h = h.reshape(x.shape[0], -1)
    h = jnp.maximum(h @ params["wfc1"] + params["bfc1"], 0.0)
    return jax.nn.sigmoid(h @ params["wfc2"] + params["bfc2"])


# ---------------------------------- main --------------------------------------

if __name__ == "__main__":
    key = jax.random.PRNGKey(0)
    kp, kx = jax.random.split(key)
    params = init_params(kp)

    # The module's fc1 (12*3*3 inputs) implies a 3x24x24 input image.
    x = jax.random.normal(kx, (2, 3, 24, 24), jnp.float32)

    fwd = jax.jit(discriminator_forward)
    out = jax.block_until_ready(fwd(params, x))

    ref = jax.block_until_ready(reference_forward(params, x))

    assert out.shape == (2, 1), out.shape
    assert jnp.allclose(out, ref, atol=1e-5, rtol=1e-5), (out, ref)
    print("KERNEL_OK")
</pallas_src>

<mosaic_0001>
module attributes {stable_mosaic.version = 11 : i64} {
  func.func @_disc_kernel(%arg0: i32, %arg1: memref<4x100x75xf32, #tpu.memory_space<vmem>>, %arg2: memref<75x6xf32, #tpu.memory_space<vmem>>, %arg3: memref<1x6xf32, #tpu.memory_space<vmem>>, %arg4: memref<25x6x12xf32, #tpu.memory_space<vmem>>, %arg5: memref<1x12xf32, #tpu.memory_space<vmem>>, %arg6: memref<9x12x32xf32, #tpu.memory_space<vmem>>, %arg7: memref<1x32xf32, #tpu.memory_space<vmem>>, %arg8: memref<1x32xf32, #tpu.memory_space<vmem>>, %arg9: memref<1x1xf32, #tpu.memory_space<vmem>>, %arg10: memref<1x1x1xf32, #tpu.memory_space<vmem>>, %arg11: memref<100x6xf32, #tpu.memory_space<vmem>>, %arg12: memref<56x12xf32, #tpu.memory_space<vmem>>) attributes {dimension_semantics = [#tpu.dimension_semantics<parallel>], iteration_bounds = array<i64: 2>, scalar_prefetch = 0 : i64, scratch_operands = 2 : i64, tpu.core_type = #tpu.core_type<tc>, window_params = [{transform_indices = @transform_0, window_bounds = array<i64: 4, 100, 75>}, {pipeline_mode = #tpu.pipeline_mode<synchronous>, transform_indices = @transform_1, window_bounds = array<i64: 75, 6>}, {pipeline_mode = #tpu.pipeline_mode<synchronous>, transform_indices = @transform_2, window_bounds = array<i64: 1, 6>}, {pipeline_mode = #tpu.pipeline_mode<synchronous>, transform_indices = @transform_3, window_bounds = array<i64: 25, 6, 12>}, {pipeline_mode = #tpu.pipeline_mode<synchronous>, transform_indices = @transform_4, window_bounds = array<i64: 1, 12>}, {pipeline_mode = #tpu.pipeline_mode<synchronous>, transform_indices = @transform_5, window_bounds = array<i64: 9, 12, 32>}, {pipeline_mode = #tpu.pipeline_mode<synchronous>, transform_indices = @transform_6, window_bounds = array<i64: 1, 32>}, {pipeline_mode = #tpu.pipeline_mode<synchronous>, transform_indices = @transform_7, window_bounds = array<i64: 1, 32>}, {pipeline_mode = #tpu.pipeline_mode<synchronous>, transform_indices = @transform_8, window_bounds = array<i64: 1, 1>}, {transform_indices = @transform_9, window_bounds = array<i64: 1, 1, 1>}]} {
    %c0 = arith.constant 0 : index
    %c0_0 = arith.constant 0 : index
    %0 = vector.load %arg2[%c0, %c0_0] : memref<75x6xf32, #tpu.memory_space<vmem>>, vector<75x6xf32>
    %c0_1 = arith.constant 0 : index
    %c0_2 = arith.constant 0 : index
    %c0_3 = arith.constant 0 : index
    %1 = vector.load %arg1[%c0_1, %c0_2, %c0_3] : memref<4x100x75xf32, #tpu.memory_space<vmem>>, vector<1x100x75xf32>
    %2 = vector.shape_cast %1 : vector<1x100x75xf32> to vector<100x75xf32>
    %cst = arith.constant dense<0.000000e+00> : vector<100x6xf32>
    %3 = tpu.matmul %2, %0, %cst {dimension_numbers = #tpu.dot_dimension_numbers<[1], [0], [0], [1], [0, 0, 1, 1], [], []>} : vector<100x75xf32>, vector<75x6xf32>, vector<100x6xf32> -> vector<100x6xf32>
    %c1 = arith.constant 1 : index
    %c0_4 = arith.constant 0 : index
    %c0_5 = arith.constant 0 : index
    %4 = vector.load %arg1[%c1, %c0_4, %c0_5] : memref<4x100x75xf32, #tpu.memory_space<vmem>>, vector<1x100x75xf32>
    %5 = vector.shape_cast %4 : vector<1x100x75xf32> to vector<100x75xf32>
    %cst_6 = arith.constant dense<0.000000e+00> : vector<100x6xf32>
    %6 = tpu.matmul %5, %0, %cst_6 {dimension_numbers = #tpu.dot_dimension_numbers<[1], [0], [0], [1], [0, 0, 1, 1], [], []>} : vector<100x75xf32>, vector<75x6xf32>, vector<100x6xf32> -> vector<100x6xf32>
    %7 = arith.maximumf %3, %6 : vector<100x6xf32>
    %c2 = arith.constant 2 : index
    %c0_7 = arith.constant 0 : index
    %c0_8 = arith.constant 0 : index
    %8 = vector.load %arg1[%c2, %c0_7, %c0_8] : memref<4x100x75xf32, #tpu.memory_space<vmem>>, vector<1x100x75xf32>
    %9 = vector.shape_cast %8 : vector<1x100x75xf32> to vector<100x75xf32>
    %cst_9 = arith.constant dense<0.000000e+00> : vector<100x6xf32>
    %10 = tpu.matmul %9, %0, %cst_9 {dimension_numbers = #tpu.dot_dimension_numbers<[1], [0], [0], [1], [0, 0, 1, 1], [], []>} : vector<100x75xf32>, vector<75x6xf32>, vector<100x6xf32> -> vector<100x6xf32>
    %11 = arith.maximumf %7, %10 : vector<100x6xf32>
    %c3 = arith.constant 3 : index
    %c0_10 = arith.constant 0 : index
    %c0_11 = arith.constant 0 : index
    %12 = vector.load %arg1[%c3, %c0_10, %c0_11] : memref<4x100x75xf32, #tpu.memory_space<vmem>>, vector<1x100x75xf32>
    %13 = vector.shape_cast %12 : vector<1x100x75xf32> to vector<100x75xf32>
    %cst_12 = arith.constant dense<0.000000e+00> : vector<100x6xf32>
    %14 = tpu.matmul %13, %0, %cst_12 {dimension_numbers = #tpu.dot_dimension_numbers<[1], [0], [0], [1], [0, 0, 1, 1], [], []>} : vector<100x75xf32>, vector<75x6xf32>, vector<100x6xf32> -> vector<100x6xf32>
    %15 = arith.maximumf %11, %14 : vector<100x6xf32>
    %c0_13 = arith.constant 0 : index
    %c0_14 = arith.constant 0 : index
    %16 = vector.load %arg3[%c0_13, %c0_14] : memref<1x6xf32, #tpu.memory_space<vmem>>, vector<1x6xf32>
    %17 = vector.broadcast %16 : vector<1x6xf32> to vector<100x6xf32>
    %18 = arith.addf %15, %17 : vector<100x6xf32>
    %cst_15 = arith.constant 0.000000e+00 : f32
    %19 = vector.broadcast %cst_15 : f32 to vector<100x6xf32>
    %20 = arith.maximumf %18, %19 : vector<100x6xf32>
    %c0_16 = arith.constant 0 : index
    %c0_17 = arith.constant 0 : index
    %21 = vector.load %arg11[%c0_16, %c0_17] : memref<100x6xf32, #tpu.memory_space<vmem>>, vector<100x6xf32>
    tpu.vector_store %arg11[%c0_16, %c0_17], %20 {strides = array<i32>} : memref<100x6xf32, #tpu.memory_space<vmem>>, vector<100x6xf32>,
    %cst_18 = arith.constant 0.000000e+00 : f32
    %22 = vector.broadcast %cst_18 : f32 to vector<56x12xf32>
    %c0_19 = arith.constant 0 : index
    %c0_20 = arith.constant 0 : index
    %23 = vector.load %arg11[%c0_19, %c0_20] : memref<100x6xf32, #tpu.memory_space<vmem>>, vector<56x6xf32>
    %c0_21 = arith.constant 0 : index
    %c0_22 = arith.constant 0 : index
    %c0_23 = arith.constant 0 : index
    %24 = vector.load %arg4[%c0_21, %c0_22, %c0_23] : memref<25x6x12xf32, #tpu.memory_space<vmem>>, vector<1x6x12xf32>
    %25 = vector.shape_cast %24 : vector<1x6x12xf32> to vector<6x12xf32>
    %cst_24 = arith.constant dense<0.000000e+00> : vector<56x12xf32>
    %26 = tpu.matmul %23, %25, %cst_24 {dimension_numbers = #tpu.dot_dimension_numbers<[1], [0], [0], [1], [0, 0, 1, 1], [], []>} : vector<56x6xf32>, vector<6x12xf32>, vector<56x12xf32> -> vector<56x12xf32>
    %27 = arith.addf %22, %26 : vector<56x12xf32>
    %c1_25 = arith.constant 1 : index
    %c0_26 = arith.constant 0 : index
    %28 = vector.load %arg11[%c1_25, %c0_26] : memref<100x6xf32, #tpu.memory_space<vmem>>, vector<56x6xf32>
    %c1_27 = arith.constant 1 : index
    %c0_28 = arith.constant 0 : index
    %c0_29 = arith.constant 0 : index
    %29 = vector.load %arg4[%c1_27, %c0_28, %c0_29] : memref<25x6x12xf32, #tpu.memory_space<vmem>>, vector<1x6x12xf32>
    %30 = vector.shape_cast %29 : vector<1x6x12xf32> to vector<6x12xf32>
    %cst_30 = arith.constant dense<0.000000e+00> : vector<56x12xf32>
    %31 = tpu.matmul %28, %30, %cst_30 {dimension_numbers = #tpu.dot_dimension_numbers<[1], [0], [0], [1], [0, 0, 1, 1], [], []>} : vector<56x6xf32>, vector<6x12xf32>, vector<56x12xf32> -> vector<56x12xf32>
    %32 = arith.addf %27, %31 : vector<56x12xf32>
    %c2_31 = arith.constant 2 : index
    %c0_32 = arith.constant 0 : index
    %33 = vector.load %arg11[%c2_31, %c0_32] : memref<100x6xf32, #tpu.memory_space<vmem>>, vector<56x6xf32>
    %c2_33 = arith.constant 2 : index
    %c0_34 = arith.constant 0 : index
    %c0_35 = arith.constant 0 : index
    %34 = vector.load %arg4[%c2_33, %c0_34, %c0_35] : memref<25x6x12xf32, #tpu.memory_space<vmem>>, vector<1x6x12xf32>
    %35 = vector.shape_cast %34 : vector<1x6x12xf32> to vector<6x12xf32>
    %cst_36 = arith.constant dense<0.000000e+00> : vector<56x12xf32>
    %36 = tpu.matmul %33, %35, %cst_36 {dimension_numbers = #tpu.dot_dimension_numbers<[1], [0], [0], [1], [0, 0, 1, 1], [], []>} : vector<56x6xf32>, vector<6x12xf32>, vector<56x12xf32> -> vector<56x12xf32>
    %37 = arith.addf %32, %36 : vector<56x12xf32>
    %c3_37 = arith.constant 3 : index
    %c0_38 = arith.constant 0 : index
    %38 = vector.load %arg11[%c3_37, %c0_38] : memref<100x6xf32, #tpu.memory_space<vmem>>, vector<56x6xf32>
    %c3_39 = arith.constant 3 : index
    %c0_40 = arith.constant 0 : index
    %c0_41 = arith.constant 0 : index
    %39 = vector.load %arg4[%c3_39, %c0_40, %c0_41] : memref<25x6x12xf32, #tpu.memory_space<vmem>>, vector<1x6x12xf32>
    %40 = vector.shape_cast %39 : vector<1x6x12xf32> to vector<6x12xf32>
    %cst_42 = arith.constant dense<0.000000e+00> : vector<56x12xf32>
    %41 = tpu.matmul %38, %40, %cst_42 {dimension_numbers = #tpu.dot_dimension_numbers<[1], [0], [0], [1], [0, 0, 1, 1], [], []>} : vector<56x6xf32>, vector<6x12xf32>, vector<56x12xf32> -> vector<56x12xf32>
    %42 = arith.addf %37, %41 : vector<56x12xf32>
    %c4 = arith.constant 4 : index
    %c0_43 = arith.constant 0 : index
    %43 = vector.load %arg11[%c4, %c0_43] : memref<100x6xf32, #tpu.memory_space<vmem>>, vector<56x6xf32>
    %c4_44 = arith.constant 4 : index
    %c0_45 = arith.constant 0 : index
    %c0_46 = arith.constant 0 : index
    %44 = vector.load %arg4[%c4_44, %c0_45, %c0_46] : memref<25x6x12xf32, #tpu.memory_space<vmem>>, vector<1x6x12xf32>
    %45 = vector.shape_cast %44 : vector<1x6x12xf32> to vector<6x12xf32>
    %cst_47 = arith.constant dense<0.000000e+00> : vector<56x12xf32>
    %46 = tpu.matmul %43, %45, %cst_47 {dimension_numbers = #tpu.dot_dimension_numbers<[1], [0], [0], [1], [0, 0, 1, 1], [], []>} : vector<56x6xf32>, vector<6x12xf32>, vector<56x12xf32> -> vector<56x12xf32>
    %47 = arith.addf %42, %46 : vector<56x12xf32>
    %c10 = arith.constant 10 : index
    %c0_48 = arith.constant 0 : index
    %48 = vector.load %arg11[%c10, %c0_48] : memref<100x6xf32, #tpu.memory_space<vmem>>, vector<56x6xf32>
    %c5 = arith.constant 5 : index
    %c0_49 = arith.constant 0 : index
    %c0_50 = arith.constant 0 : index
    %49 = vector.load %arg4[%c5, %c0_49, %c0_50] : memref<25x6x12xf32, #tpu.memory_space<vmem>>, vector<1x6x12xf32>
    %50 = vector.shape_cast %49 : vector<1x6x12xf32> to vector<6x12xf32>
    %cst_51 = arith.constant dense<0.000000e+00> : vector<56x12xf32>
    %51 = tpu.matmul %48, %50, %cst_51 {dimension_numbers = #tpu.dot_dimension_numbers<[1], [0], [0], [1], [0, 0, 1, 1], [], []>} : vector<56x6xf32>, vector<6x12xf32>, vector<56x12xf32> -> vector<56x12xf32>
    %52 = arith.addf %47, %51 : vector<56x12xf32>
    %c11 = arith.constant 11 : index
    %c0_52 = arith.constant 0 : index
    %53 = vector.load %arg11[%c11, %c0_52] : memref<100x6xf32, #tpu.memory_space<vmem>>, vector<56x6xf32>
    %c6 = arith.constant 6 : index
    %c0_53 = arith.constant 0 : index
    %c0_54 = arith.constant 0 : index
    %54 = vector.load %arg4[%c6, %c0_53, %c0_54] : memref<25x6x12xf32, #tpu.memory_space<vmem>>, vector<1x6x12xf32>
    %55 = vector.shape_cast %54 : vector<1x6x12xf32> to vector<6x12xf32>
    %cst_55 = arith.constant dense<0.000000e+00> : vector<56x12xf32>
    %56 = tpu.matmul %53, %55, %cst_55 {dimension_numbers = #tpu.dot_dimension_numbers<[1], [0], [0], [1], [0, 0, 1, 1], [], []>} : vector<56x6xf32>, vector<6x12xf32>, vector<56x12xf32> -> vector<56x12xf32>
    %57 = arith.addf %52, %56 : vector<56x12xf32>
    %c12 = arith.constant 12 : index
    %c0_56 = arith.constant 0 : index
    %58 = vector.load %arg11[%c12, %c0_56] : memref<100x6xf32, #tpu.memory_space<vmem>>, vector<56x6xf32>
    %c7 = arith.constant 7 : index
    %c0_57 = arith.constant 0 : index
    %c0_58 = arith.constant 0 : index
    %59 = vector.load %arg4[%c7, %c0_57, %c0_58] : memref<25x6x12xf32, #tpu.memory_space<vmem>>, vector<1x6x12xf32>
    %60 = vector.shape_cast %59 : vector<1x6x12xf32> to vector<6x12xf32>
    %cst_59 = arith.constant dense<0.000000e+00> : vector<56x12xf32>
    %61 = tpu.matmul %58, %60, %cst_59 {dimension_numbers = #tpu.dot_dimension_numbers<[1], [0], [0], [1], [0, 0, 1, 1], [], []>} : vector<56x6xf32>, vector<6x12xf32>, vector<56x12xf32> -> vector<56x12xf32>
    %62 = arith.addf %57, %61 : vector<56x12xf32>
    %c13 = arith.constant 13 : index
    %c0_60 = arith.constant 0 : index
    %63 = vector.load %arg11[%c13, %c0_60] : memref<100x6xf32, #tpu.memory_space<vmem>>, vector<56x6xf32>
    %c8 = arith.constant 8 : index
    %c0_61 = arith.constant 0 : index
    %c0_62 = arith.constant 0 : index
    %64 = vector.load %arg4[%c8, %c0_61, %c0_62] : memref<25x6x12xf32, #tpu.memory_space<vmem>>, vector<1x6x12xf32>
    %65 = vector.shape_cast %64 : vector<1x6x12xf32> to vector<6x12xf32>
    %cst_63 = arith.constant dense<0.000000e+00> : vector<56x12xf32>
    %66 = tpu.matmul %63, %65, %cst_63 {dimension_numbers = #tpu.dot_dimension_numbers<[1], [0], [0], [1], [0, 0, 1, 1], [], []>} : vector<56x6xf32>, vector<6x12xf32>, vector<56x12xf32> -> vector<56x12xf32>
    %67 = arith.addf %62, %66 : vector<56x12xf32>
    %c14 = arith.constant 14 : index
    %c0_64 = arith.constant 0 : index
    %68 = vector.load %arg11[%c14, %c0_64] : memref<100x6xf32, #tpu.memory_space<vmem>>, vector<56x6xf32>
    %c9 = arith.constant 9 : index
    %c0_65 = arith.constant 0 : index
    %c0_66 = arith.constant 0 : index
    %69 = vector.load %arg4[%c9, %c0_65, %c0_66] : memref<25x6x12xf32, #tpu.memory_space<vmem>>, vector<1x6x12xf32>
    %70 = vector.shape_cast %69 : vector<1x6x12xf32> to vector<6x12xf32>
    %cst_67 = arith.constant dense<0.000000e+00> : vector<56x12xf32>
    %71 = tpu.matmul %68, %70, %cst_67 {dimension_numbers = #tpu.dot_dimension_numbers<[1], [0], [0], [1], [0, 0, 1, 1], [], []>} : vector<56x6xf32>, vector<6x12xf32>, vector<56x12xf32> -> vector<56x12xf32>
    %72 = arith.addf %67, %71 : vector<56x12xf32>
    %c20 = arith.constant 20 : index
    %c0_68 = arith.constant 0 : index
    %73 = vector.load %arg11[%c20, %c0_68] : memref<100x6xf32, #tpu.memory_space<vmem>>, vector<56x6xf32>
    %c10_69 = arith.constant 10 : index
    %c0_70 = arith.constant 0 : index
    %c0_71 = arith.constant 0 : index
    %74 = vector.load %arg4[%c10_69, %c0_70, %c0_71] : memref<25x6x12xf32, #tpu.memory_space<vmem>>, vector<1x6x12xf32>
    %75 = vector.shape_cast %74 : vector<1x6x12xf32> to vector<6x12xf32>
    %cst_72 = arith.constant dense<0.000000e+00> : vector<56x12xf32>
    %76 = tpu.matmul %73, %75, %cst_72 {dimension_numbers = #tpu.dot_dimension_numbers<[1], [0], [0], [1], [0, 0, 1, 1], [], []>} : vector<56x6xf32>, vector<6x12xf32>, vector<56x12xf32> -> vector<56x12xf32>
    %77 = arith.addf %72, %76 : vector<56x12xf32>
    %c21 = arith.constant 21 : index
    %c0_73 = arith.constant 0 : index
    %78 = vector.load %arg11[%c21, %c0_73] : memref<100x6xf32, #tpu.memory_space<vmem>>, vector<56x6xf32>
    %c11_74 = arith.constant 11 : index
    %c0_75 = arith.constant 0 : index
    %c0_76 = arith.constant 0 : index
    %79 = vector.load %arg4[%c11_74, %c0_75, %c0_76] : memref<25x6x12xf32, #tpu.memory_space<vmem>>, vector<1x6x12xf32>
    %80 = vector.shape_cast %79 : vector<1x6x12xf32> to vector<6x12xf32>
    %cst_77 = arith.constant dense<0.000000e+00> : vector<56x12xf32>
    %81 = tpu.matmul %78, %80, %cst_77 {dimension_numbers = #tpu.dot_dimension_numbers<[1], [0], [0], [1], [0, 0, 1, 1], [], []>} : vector<56x6xf32>, vector<6x12xf32>, vector<56x12xf32> -> vector<56x12xf32>
    %82 = arith.addf %77, %81 : vector<56x12xf32>
    %c22 = arith.constant 22 : index
    %c0_78 = arith.constant 0 : index
    %83 = vector.load %arg11[%c22, %c0_78] : memref<100x6xf32, #tpu.memory_space<vmem>>, vector<56x6xf32>
    %c12_79 = arith.constant 12 : index
    %c0_80 = arith.constant 0 : index
    %c0_81 = arith.constant 0 : index
    %84 = vector.load %arg4[%c12_79, %c0_80, %c0_81] : memref<25x6x12xf32, #tpu.memory_space<vmem>>, vector<1x6x12xf32>
    %85 = vector.shape_cast %84 : vector<1x6x12xf32> to vector<6x12xf32>
    %cst_82 = arith.constant dense<0.000000e+00> : vector<56x12xf32>
    %86 = tpu.matmul %83, %85, %cst_82 {dimension_numbers = #tpu.dot_dimension_numbers<[1], [0], [0], [1], [0, 0, 1, 1], [], []>} : vector<56x6xf32>, vector<6x12xf32>, vector<56x12xf32> -> vector<56x12xf32>
    %87 = arith.addf %82, %86 : vector<56x12xf32>
    %c23 = arith.constant 23 : index
    %c0_83 = arith.constant 0 : index
    %88 = vector.load %arg11[%c23, %c0_83] : memref<100x6xf32, #tpu.memory_space<vmem>>, vector<56x6xf32>
    %c13_84 = arith.constant 13 : index
    %c0_85 = arith.constant 0 : index
    %c0_86 = arith.constant 0 : index
    %89 = vector.load %arg4[%c13_84, %c0_85, %c0_86] : memref<25x6x12xf32, #tpu.memory_space<vmem>>, vector<1x6x12xf32>
    %90 = vector.shape_cast %89 : vector<1x6x12xf32> to vector<6x12xf32>
    %cst_87 = arith.constant dense<0.000000e+00> : vector<56x12xf32>
    %91 = tpu.matmul %88, %90, %cst_87 {dimension_numbers = #tpu.dot_dimension_numbers<[1], [0], [0], [1], [0, 0, 1, 1], [], []>} : vector<56x6xf32>, vector<6x12xf32>, vector<56x12xf32> -> vector<56x12xf32>
    %92 = arith.addf %87, %91 : vector<56x12xf32>
    %c24 = arith.constant 24 : index
    %c0_88 = arith.constant 0 : index
    %93 = vector.load %arg11[%c24, %c0_88] : memref<100x6xf32, #tpu.memory_space<vmem>>, vector<56x6xf32>
    %c14_89 = arith.constant 14 : index
    %c0_90 = arith.constant 0 : index
    %c0_91 = arith.constant 0 : index
    %94 = vector.load %arg4[%c14_89, %c0_90, %c0_91] : memref<25x6x12xf32, #tpu.memory_space<vmem>>, vector<1x6x12xf32>
    %95 = vector.shape_cast %94 : vector<1x6x12xf32> to vector<6x12xf32>
    %cst_92 = arith.constant dense<0.000000e+00> : vector<56x12xf32>
    %96 = tpu.matmul %93, %95, %cst_92 {dimension_numbers = #tpu.dot_dimension_numbers<[1], [0], [0], [1], [0, 0, 1, 1], [], []>} : vector<56x6xf32>, vector<6x12xf32>, vector<56x12xf32> -> vector<56x12xf32>
    %97 = arith.addf %92, %96 : vector<56x12xf32>
    %c30 = arith.constant 30 : index
    %c0_93 = arith.constant 0 : index
    %98 = vector.load %arg11[%c30, %c0_93] : memref<100x6xf32, #tpu.memory_space<vmem>>, vector<56x6xf32>
    %c15 = arith.constant 15 : index
    %c0_94 = arith.constant 0 : index
    %c0_95 = arith.constant 0 : index
    %99 = vector.load %arg4[%c15, %c0_94, %c0_95] : memref<25x6x12xf32, #tpu.memory_space<vmem>>, vector<1x6x12xf32>
    %100 = vector.shape_cast %99 : vector<1x6x12xf32> to vector<6x12xf32>
    %cst_96 = arith.constant dense<0.000000e+00> : vector<56x12xf32>
    %101 = tpu.matmul %98, %100, %cst_96 {dimension_numbers = #tpu.dot_dimension_numbers<[1], [0], [0], [1], [0, 0, 1, 1], [], []>} : vector<56x6xf32>, vector<6x12xf32>, vector<56x12xf32> -> vector<56x12xf32>
    %102 = arith.addf %97, %101 : vector<56x12xf32>
    %c31 = arith.constant 31 : index
    %c0_97 = arith.constant 0 : index
    %103 = vector.load %arg11[%c31, %c0_97] : memref<100x6xf32, #tpu.memory_space<vmem>>, vector<56x6xf32>
    %c16 = arith.constant 16 : index
    %c0_98 = arith.constant 0 : index
    %c0_99 = arith.constant 0 : index
    %104 = vector.load %arg4[%c16, %c0_98, %c0_99] : memref<25x6x12xf32, #tpu.memory_space<vmem>>, vector<1x6x12xf32>
    %105 = vector.shape_cast %104 : vector<1x6x12xf32> to vector<6x12xf32>
    %cst_100 = arith.constant dense<0.000000e+00> : vector<56x12xf32>
    %106 = tpu.matmul %103, %105, %cst_100 {dimension_numbers = #tpu.dot_dimension_numbers<[1], [0], [0], [1], [0, 0, 1, 1], [], []>} : vector<56x6xf32>, vector<6x12xf32>, vector<56x12xf32> -> vector<56x12xf32>
    %107 = arith.addf %102, %106 : vector<56x12xf32>
    %c32 = arith.constant 32 : index
    %c0_101 = arith.constant 0 : index
    %108 = vector.load %arg11[%c32, %c0_101] : memref<100x6xf32, #tpu.memory_space<vmem>>, vector<56x6xf32>
    %c17 = arith.constant 17 : index
    %c0_102 = arith.constant 0 : index
    %c0_103 = arith.constant 0 : index
    %109 = vector.load %arg4[%c17, %c0_102, %c0_103] : memref<25x6x12xf32, #tpu.memory_space<vmem>>, vector<1x6x12xf32>
    %110 = vector.shape_cast %109 : vector<1x6x12xf32> to vector<6x12xf32>
    %cst_104 = arith.constant dense<0.000000e+00> : vector<56x12xf32>
    %111 = tpu.matmul %108, %110, %cst_104 {dimension_numbers = #tpu.dot_dimension_numbers<[1], [0], [0], [1], [0, 0, 1, 1], [], []>} : vector<56x6xf32>, vector<6x12xf32>, vector<56x12xf32> -> vector<56x12xf32>
    %112 = arith.addf %107, %111 : vector<56x12xf32>
    %c33 = arith.constant 33 : index
    %c0_105 = arith.constant 0 : index
    %113 = vector.load %arg11[%c33, %c0_105] : memref<100x6xf32, #tpu.memory_space<vmem>>, vector<56x6xf32>
    %c18 = arith.constant 18 : index
    %c0_106 = arith.constant 0 : index
    %c0_107 = arith.constant 0 : index
    %114 = vector.load %arg4[%c18, %c0_106, %c0_107] : memref<25x6x12xf32, #tpu.memory_space<vmem>>, vector<1x6x12xf32>
    %115 = vector.shape_cast %114 : vector<1x6x12xf32> to vector<6x12xf32>
    %cst_108 = arith.constant dense<0.000000e+00> : vector<56x12xf32>
    %116 = tpu.matmul %113, %115, %cst_108 {dimension_numbers = #tpu.dot_dimension_numbers<[1], [0], [0], [1], [0, 0, 1, 1], [], []>} : vector<56x6xf32>, vector<6x12xf32>, vector<56x12xf32> -> vector<56x12xf32>
    %117 = arith.addf %112, %116 : vector<56x12xf32>
    %c34 = arith.constant 34 : index
    %c0_109 = arith.constant 0 : index
    %118 = vector.load %arg11[%c34, %c0_109] : memref<100x6xf32, #tpu.memory_space<vmem>>, vector<56x6xf32>
    %c19 = arith.constant 19 : index
    %c0_110 = arith.constant 0 : index
    %c0_111 = arith.constant 0 : index
    %119 = vector.load %arg4[%c19, %c0_110, %c0_111] : memref<25x6x12xf32, #tpu.memory_space<vmem>>, vector<1x6x12xf32>
    %120 = vector.shape_cast %119 : vector<1x6x12xf32> to vector<6x12xf32>
    %cst_112 = arith.constant dense<0.000000e+00> : vector<56x12xf32>
    %121 = tpu.matmul %118, %120, %cst_112 {dimension_numbers = #tpu.dot_dimension_numbers<[1], [0], [0], [1], [0, 0, 1, 1], [], []>} : vector<56x6xf32>, vector<6x12xf32>, vector<56x12xf32> -> vector<56x12xf32>
    %122 = arith.addf %117, %121 : vector<56x12xf32>
    %c40 = arith.constant 40 : index
    %c0_113 = arith.constant 0 : index
    %123 = vector.load %arg11[%c40, %c0_113] : memref<100x6xf32, #tpu.memory_space<vmem>>, vector<56x6xf32>
    %c20_114 = arith.constant 20 : index
    %c0_115 = arith.constant 0 : index
    %c0_116 = arith.constant 0 : index
    %124 = vector.load %arg4[%c20_114, %c0_115, %c0_116] : memref<25x6x12xf32, #tpu.memory_space<vmem>>, vector<1x6x12xf32>
    %125 = vector.shape_cast %124 : vector<1x6x12xf32> to vector<6x12xf32>
    %cst_117 = arith.constant dense<0.000000e+00> : vector<56x12xf32>
    %126 = tpu.matmul %123, %125, %cst_117 {dimension_numbers = #tpu.dot_dimension_numbers<[1], [0], [0], [1], [0, 0, 1, 1], [], []>} : vector<56x6xf32>, vector<6x12xf32>, vector<56x12xf32> -> vector<56x12xf32>
    %127 = arith.addf %122, %126 : vector<56x12xf32>
    %c41 = arith.constant 41 : index
    %c0_118 = arith.constant 0 : index
    %128 = vector.load %arg11[%c41, %c0_118] : memref<100x6xf32, #tpu.memory_space<vmem>>, vector<56x6xf32>
    %c21_119 = arith.constant 21 : index
    %c0_120 = arith.constant 0 : index
    %c0_121 = arith.constant 0 : index
    %129 = vector.load %arg4[%c21_119, %c0_120, %c0_121] : memref<25x6x12xf32, #tpu.memory_space<vmem>>, vector<1x6x12xf32>
    %130 = vector.shape_cast %129 : vector<1x6x12xf32> to vector<6x12xf32>
    %cst_122 = arith.constant dense<0.000000e+00> : vector<56x12xf32>
    %131 = tpu.matmul %128, %130, %cst_122 {dimension_numbers = #tpu.dot_dimension_numbers<[1], [0], [0], [1], [0, 0, 1, 1], [], []>} : vector<56x6xf32>, vector<6x12xf32>, vector<56x12xf32> -> vector<56x12xf32>
    %132 = arith.addf %127, %131 : vector<56x12xf32>
    %c42 = arith.constant 42 : index
    %c0_123 = arith.constant 0 : index
    %133 = vector.load %arg11[%c42, %c0_123] : memref<100x6xf32, #tpu.memory_space<vmem>>, vector<56x6xf32>
    %c22_124 = arith.constant 22 : index
    %c0_125 = arith.constant 0 : index
    %c0_126 = arith.constant 0 : index
    %134 = vector.load %arg4[%c22_124, %c0_125, %c0_126] : memref<25x6x12xf32, #tpu.memory_space<vmem>>, vector<1x6x12xf32>
    %135 = vector.shape_cast %134 : vector<1x6x12xf32> to vector<6x12xf32>
    %cst_127 = arith.constant dense<0.000000e+00> : vector<56x12xf32>
    %136 = tpu.matmul %133, %135, %cst_127 {dimension_numbers = #tpu.dot_dimension_numbers<[1], [0], [0], [1], [0, 0, 1, 1], [], []>} : vector<56x6xf32>, vector<6x12xf32>, vector<56x12xf32> -> vector<56x12xf32>
    %137 = arith.addf %132, %136 : vector<56x12xf32>
    %c43 = arith.constant 43 : index
    %c0_128 = arith.constant 0 : index
    %138 = vector.load %arg11[%c43, %c0_128] : memref<100x6xf32, #tpu.memory_space<vmem>>, vector<56x6xf32>
    %c23_129 = arith.constant 23 : index
    %c0_130 = arith.constant 0 : index
    %c0_131 = arith.constant 0 : index
    %139 = vector.load %arg4[%c23_129, %c0_130, %c0_131] : memref<25x6x12xf32, #tpu.memory_space<vmem>>, vector<1x6x12xf32>
    %140 = vector.shape_cast %139 : vector<1x6x12xf32> to vector<6x12xf32>
    %cst_132 = arith.constant dense<0.000000e+00> : vector<56x12xf32>
    %141 = tpu.matmul %138, %140, %cst_132 {dimension_numbers = #tpu.dot_dimension_numbers<[1], [0], [0], [1], [0, 0, 1, 1], [], []>} : vector<56x6xf32>, vector<6x12xf32>, vector<56x12xf32> -> vector<56x12xf32>
    %142 = arith.addf %137, %141 : vector<56x12xf32>
    %c44 = arith.constant 44 : index
    %c0_133 = arith.constant 0 : index
    %143 = vector.load %arg11[%c44, %c0_133] : memref<100x6xf32, #tpu.memory_space<vmem>>, vector<56x6xf32>
    %c24_134 = arith.constant 24 : index
    %c0_135 = arith.constant 0 : index
    %c0_136 = arith.constant 0 : index
    %144 = vector.load %arg4[%c24_134, %c0_135, %c0_136] : memref<25x6x12xf32, #tpu.memory_space<vmem>>, vector<1x6x12xf32>
    %145 = vector.shape_cast %144 : vector<1x6x12xf32> to vector<6x12xf32>
    %cst_137 = arith.constant dense<0.000000e+00> : vector<56x12xf32>
    %146 = tpu.matmul %143, %145, %cst_137 {dimension_numbers = #tpu.dot_dimension_numbers<[1], [0], [0], [1], [0, 0, 1, 1], [], []>} : vector<56x6xf32>, vector<6x12xf32>, vector<56x12xf32> -> vector<56x12xf32>
    %147 = arith.addf %142, %146 : vector<56x12xf32>
    %c0_138 = arith.constant 0 : index
    %c0_139 = arith.constant 0 : index
    %148 = vector.load %arg12[%c0_138, %c0_139] : memref<56x12xf32, #tpu.memory_space<vmem>>, vector<56x12xf32>
    tpu.vector_store %arg12[%c0_138, %c0_139], %147 {strides = array<i32>} : memref<56x12xf32, #tpu.memory_space<vmem>>, vector<56x12xf32>,
    %c0_140 = arith.constant 0 : index
    %c0_141 = arith.constant 0 : index
    %149 = vector.load %arg5[%c0_140, %c0_141] : memref<1x12xf32, #tpu.memory_space<vmem>>, vector<1x12xf32>
    %cst_142 = arith.constant 0.000000e+00 : f32
    %150 = vector.broadcast %cst_142 : f32 to vector<1x32xf32>
    %c0_143 = arith.constant 0 : index
    %c0_144 = arith.constant 0 : index
    %151 = vector.load %arg12[%c0_143, %c0_144] : memref<56x12xf32, #tpu.memory_space<vmem>>, vector<2x12xf32>
    %c10_145 = arith.constant 10 : index
    %c0_146 = arith.constant 0 : index
    %152 = vector.load %arg12[%c10_145, %c0_146] : memref<56x12xf32, #tpu.memory_space<vmem>>, vector<2x12xf32>
    %153 = arith.maximumf %151, %152 : vector<2x12xf32>
    %154 = vector.extract_strided_slice %153 {offsets = [0, 0], sizes = [1, 12], strides = [1, 1]} : vector<2x12xf32> to vector<1x12xf32>
    %155 = vector.extract_strided_slice %153 {offsets = [1, 0], sizes = [1, 12], strides = [1, 1]} : vector<2x12xf32> to vector<1x12xf32>
    %156 = arith.maximumf %154, %155 : vector<1x12xf32>
    %157 = arith.addf %156, %149 : vector<1x12xf32>
    %cst_147 = arith.constant 0.000000e+00 : f32
    %158 = vector.broadcast %cst_147 : f32 to vector<1x12xf32>
    %159 = arith.maximumf %157, %158 : vector<1x12xf32>
    %c0_148 = arith.constant 0 : index
    %c0_149 = arith.constant 0 : index
    %c0_150 = arith.constant 0 : index
    %160 = vector.load %arg6[%c0_148, %c0_149, %c0_150] : memref<9x12x32xf32, #tpu.memory_space<vmem>>, vector<1x12x32xf32>
    %161 = vector.shape_cast %160 : vector<1x12x32xf32> to vector<12x32xf32>
    %cst_151 = arith.constant dense<0.000000e+00> : vector<1x32xf32>
    %162 = tpu.matmul %159, %161, %cst_151 {dimension_numbers = #tpu.dot_dimension_numbers<[1], [0], [0], [1], [0, 0, 1, 1], [], []>} : vector<1x12xf32>, vector<12x32xf32>, vector<1x32xf32> -> vector<1x32xf32>
    %163 = arith.addf %150, %162 : vector<1x32xf32>
    %c2_152 = arith.constant 2 : index
    %c0_153 = arith.constant 0 : index
    %164 = vector.load %arg12[%c2_152, %c0_153] : memref<56x12xf32, #tpu.memory_space<vmem>>, vector<2x12xf32>
    %c12_154 = arith.constant 12 : index
    %c0_155 = arith.constant 0 : index
    %165 = vector.load %arg12[%c12_154, %c0_155] : memref<56x12xf32, #tpu.memory_space<vmem>>, vector<2x12xf32>
    %166 = arith.maximumf %164, %165 : vector<2x12xf32>
    %167 = vector.extract_strided_slice %166 {offsets = [0, 0], sizes = [1, 12], strides = [1, 1]} : vector<2x12xf32> to vector<1x12xf32>
    %168 = vector.extract_strided_slice %166 {offsets = [1, 0], sizes = [1, 12], strides = [1, 1]} : vector<2x12xf32> to vector<1x12xf32>
    %169 = arith.maximumf %167, %168 : vector<1x12xf32>
    %170 = arith.addf %169, %149 : vector<1x12xf32>
    %cst_156 = arith.constant 0.000000e+00 : f32
    %171 = vector.broadcast %cst_156 : f32 to vector<1x12xf32>
    %172 = arith.maximumf %170, %171 : vector<1x12xf32>
    %c1_157 = arith.constant 1 : index
    %c0_158 = arith.constant 0 : index
    %c0_159 = arith.constant 0 : index
    %173 = vector.load %arg6[%c1_157, %c0_158, %c0_159] : memref<9x12x32xf32, #tpu.memory_space<vmem>>, vector<1x12x32xf32>
    %174 = vector.shape_cast %173 : vector<1x12x32xf32> to vector<12x32xf32>
    %cst_160 = arith.constant dense<0.000000e+00> : vector<1x32xf32>
    %175 = tpu.matmul %172, %174, %cst_160 {dimension_numbers = #tpu.dot_dimension_numbers<[1], [0], [0], [1], [0, 0, 1, 1], [], []>} : vector<1x12xf32>, vector<12x32xf32>, vector<1x32xf32> -> vector<1x32xf32>
    %176 = arith.addf %163, %175 : vector<1x32xf32>
    %c4_161 = arith.constant 4 : index
    %c0_162 = arith.constant 0 : index
    %177 = vector.load %arg12[%c4_161, %c0_162] : memref<56x12xf32, #tpu.memory_space<vmem>>, vector<2x12xf32>
    %c14_163 = arith.constant 14 : index
    %c0_164 = arith.constant 0 : index
    %178 = vector.load %arg12[%c14_163, %c0_164] : memref<56x12xf32, #tpu.memory_space<vmem>>, vector<2x12xf32>
    %179 = arith.maximumf %177, %178 : vector<2x12xf32>
    %180 = vector.extract_strided_slice %179 {offsets = [0, 0], sizes = [1, 12], strides = [1, 1]} : vector<2x12xf32> to vector<1x12xf32>
    %181 = vector.extract_strided_slice %179 {offsets = [1, 0], sizes = [1, 12], strides = [1, 1]} : vector<2x12xf32> to vector<1x12xf32>
    %182 = arith.maximumf %180, %181 : vector<1x12xf32>
    %183 = arith.addf %182, %149 : vector<1x12xf32>
    %cst_165 = arith.constant 0.000000e+00 : f32
    %184 = vector.broadcast %cst_165 : f32 to vector<1x12xf32>
    %185 = arith.maximumf %183, %184 : vector<1x12xf32>
    %c2_166 = arith.constant 2 : index
    %c0_167 = arith.constant 0 : index
    %c0_168 = arith.constant 0 : index
    %186 = vector.load %arg6[%c2_166, %c0_167, %c0_168] : memref<9x12x32xf32, #tpu.memory_space<vmem>>, vector<1x12x32xf32>
    %187 = vector.shape_cast %186 : vector<1x12x32xf32> to vector<12x32xf32>
    %cst_169 = arith.constant dense<0.000000e+00> : vector<1x32xf32>
    %188 = tpu.matmul %185, %187, %cst_169 {dimension_numbers = #tpu.dot_dimension_numbers<[1], [0], [0], [1], [0, 0, 1, 1], [], []>} : vector<1x12xf32>, vector<12x32xf32>, vector<1x32xf32> -> vector<1x32xf32>
    %189 = arith.addf %176, %188 : vector<1x32xf32>
    %c20_170 = arith.constant 20 : index
    %c0_171 = arith.constant 0 : index
    %190 = vector.load %arg12[%c20_170, %c0_171] : memref<56x12xf32, #tpu.memory_space<vmem>>, vector<2x12xf32>
    %c30_172 = arith.constant 30 : index
    %c0_173 = arith.constant 0 : index
    %191 = vector.load %arg12[%c30_172, %c0_173] : memref<56x12xf32, #tpu.memory_space<vmem>>, vector<2x12xf32>
    %192 = arith.maximumf %190, %191 : vector<2x12xf32>
    %193 = vector.extract_strided_slice %192 {offsets = [0, 0], sizes = [1, 12], strides = [1, 1]} : vector<2x12xf32> to vector<1x12xf32>
    %194 = vector.extract_strided_slice %192 {offsets = [1, 0], sizes = [1, 12], strides = [1, 1]} : vector<2x12xf32> to vector<1x12xf32>
    %195 = arith.maximumf %193, %194 : vector<1x12xf32>
    %196 = arith.addf %195, %149 : vector<1x12xf32>
    %cst_174 = arith.constant 0.000000e+00 : f32
    %197 = vector.broadcast %cst_174 : f32 to vector<1x12xf32>
    %198 = arith.maximumf %196, %197 : vector<1x12xf32>
    %c3_175 = arith.constant 3 : index
    %c0_176 = arith.constant 0 : index
    %c0_177 = arith.constant 0 : index
    %199 = vector.load %arg6[%c3_175, %c0_176, %c0_177] : memref<9x12x32xf32, #tpu.memory_space<vmem>>, vector<1x12x32xf32>
    %200 = vector.shape_cast %199 : vector<1x12x32xf32> to vector<12x32xf32>
    %cst_178 = arith.constant dense<0.000000e+00> : vector<1x32xf32>
    %201 = tpu.matmul %198, %200, %cst_178 {dimension_numbers = #tpu.dot_dimension_numbers<[1], [0], [0], [1], [0, 0, 1, 1], [], []>} : vector<1x12xf32>, vector<12x32xf32>, vector<1x32xf32> -> vector<1x32xf32>
    %202 = arith.addf %189, %201 : vector<1x32xf32>
    %c22_179 = arith.constant 22 : index
    %c0_180 = arith.constant 0 : index
    %203 = vector.load %arg12[%c22_179, %c0_180] : memref<56x12xf32, #tpu.memory_space<vmem>>, vector<2x12xf32>
    %c32_181 = arith.constant 32 : index
    %c0_182 = arith.constant 0 : index
    %204 = vector.load %arg12[%c32_181, %c0_182] : memref<56x12xf32, #tpu.memory_space<vmem>>, vector<2x12xf32>
    %205 = arith.maximumf %203, %204 : vector<2x12xf32>
    %206 = vector.extract_strided_slice %205 {offsets = [0, 0], sizes = [1, 12], strides = [1, 1]} : vector<2x12xf32> to vector<1x12xf32>
    %207 = vector.extract_strided_slice %205 {offsets = [1, 0], sizes = [1, 12], strides = [1, 1]} : vector<2x12xf32> to vector<1x12xf32>
    %208 = arith.maximumf %206, %207 : vector<1x12xf32>
    %209 = arith.addf %208, %149 : vector<1x12xf32>
    %cst_183 = arith.constant 0.000000e+00 : f32
    %210 = vector.broadcast %cst_183 : f32 to vector<1x12xf32>
    %211 = arith.maximumf %209, %210 : vector<1x12xf32>
    %c4_184 = arith.constant 4 : index
    %c0_185 = arith.constant 0 : index
    %c0_186 = arith.constant 0 : index
    %212 = vector.load %arg6[%c4_184, %c0_185, %c0_186] : memref<9x12x32xf32, #tpu.memory_space<vmem>>, vector<1x12x32xf32>
    %213 = vector.shape_cast %212 : vector<1x12x32xf32> to vector<12x32xf32>
    %cst_187 = arith.constant dense<0.000000e+00> : vector<1x32xf32>
    %214 = tpu.matmul %211, %213, %cst_187 {dimension_numbers = #tpu.dot_dimension_numbers<[1], [0], [0], [1], [0, 0, 1, 1], [], []>} : vector<1x12xf32>, vector<12x32xf32>, vector<1x32xf32> -> vector<1x32xf32>
    %215 = arith.addf %202, %214 : vector<1x32xf32>
    %c24_188 = arith.constant 24 : index
    %c0_189 = arith.constant 0 : index
    %216 = vector.load %arg12[%c24_188, %c0_189] : memref<56x12xf32, #tpu.memory_space<vmem>>, vector<2x12xf32>
    %c34_190 = arith.constant 34 : index
    %c0_191 = arith.constant 0 : index
    %217 = vector.load %arg12[%c34_190, %c0_191] : memref<56x12xf32, #tpu.memory_space<vmem>>, vector<2x12xf32>
    %218 = arith.maximumf %216, %217 : vector<2x12xf32>
    %219 = vector.extract_strided_slice %218 {offsets = [0, 0], sizes = [1, 12], strides = [1, 1]} : vector<2x12xf32> to vector<1x12xf32>
    %220 = vector.extract_strided_slice %218 {offsets = [1, 0], sizes = [1, 12], strides = [1, 1]} : vector<2x12xf32> to vector<1x12xf32>
    %221 = arith.maximumf %219, %220 : vector<1x12xf32>
    %222 = arith.addf %221, %149 : vector<1x12xf32>
    %cst_192 = arith.constant 0.000000e+00 : f32
    %223 = vector.broadcast %cst_192 : f32 to vector<1x12xf32>
    %224 = arith.maximumf %222, %223 : vector<1x12xf32>
    %c5_193 = arith.constant 5 : index
    %c0_194 = arith.constant 0 : index
    %c0_195 = arith.constant 0 : index
    %225 = vector.load %arg6[%c5_193, %c0_194, %c0_195] : memref<9x12x32xf32, #tpu.memory_space<vmem>>, vector<1x12x32xf32>
    %226 = vector.shape_cast %225 : vector<1x12x32xf32> to vector<12x32xf32>
    %cst_196 = arith.constant dense<0.000000e+00> : vector<1x32xf32>
    %227 = tpu.matmul %224, %226, %cst_196 {dimension_numbers = #tpu.dot_dimension_numbers<[1], [0], [0], [1], [0, 0, 1, 1], [], []>} : vector<1x12xf32>, vector<12x32xf32>, vector<1x32xf32> -> vector<1x32xf32>
    %228 = arith.addf %215, %227 : vector<1x32xf32>
    %c40_197 = arith.constant 40 : index
    %c0_198 = arith.constant 0 : index
    %229 = vector.load %arg12[%c40_197, %c0_198] : memref<56x12xf32, #tpu.memory_space<vmem>>, vector<2x12xf32>
    %c50 = arith.constant 50 : index
    %c0_199 = arith.constant 0 : index
    %230 = vector.load %arg12[%c50, %c0_199] : memref<56x12xf32, #tpu.memory_space<vmem>>, vector<2x12xf32>
    %231 = arith.maximumf %229, %230 : vector<2x12xf32>
    %232 = vector.extract_strided_slice %231 {offsets = [0, 0], sizes = [1, 12], strides = [1, 1]} : vector<2x12xf32> to vector<1x12xf32>
    %233 = vector.extract_strided_slice %231 {offsets = [1, 0], sizes = [1, 12], strides = [1, 1]} : vector<2x12xf32> to vector<1x12xf32>
    %234 = arith.maximumf %232, %233 : vector<1x12xf32>
    %235 = arith.addf %234, %149 : vector<1x12xf32>
    %cst_200 = arith.constant 0.000000e+00 : f32
    %236 = vector.broadcast %cst_200 : f32 to vector<1x12xf32>
    %237 = arith.maximumf %235, %236 : vector<1x12xf32>
    %c6_201 = arith.constant 6 : index
    %c0_202 = arith.constant 0 : index
    %c0_203 = arith.constant 0 : index
    %238 = vector.load %arg6[%c6_201, %c0_202, %c0_203] : memref<9x12x32xf32, #tpu.memory_space<vmem>>, vector<1x12x32xf32>
    %239 = vector.shape_cast %238 : vector<1x12x32xf32> to vector<12x32xf32>
    %cst_204 = arith.constant dense<0.000000e+00> : vector<1x32xf32>
    %240 = tpu.matmul %237, %239, %cst_204 {dimension_numbers = #tpu.dot_dimension_numbers<[1], [0], [0], [1], [0, 0, 1, 1], [], []>} : vector<1x12xf32>, vector<12x32xf32>, vector<1x32xf32> -> vector<1x32xf32>
    %241 = arith.addf %228, %240 : vector<1x32xf32>
    %c42_205 = arith.constant 42 : index
    %c0_206 = arith.constant 0 : index
    %242 = vector.load %arg12[%c42_205, %c0_206] : memref<56x12xf32, #tpu.memory_space<vmem>>, vector<2x12xf32>
    %c52 = arith.constant 52 : index
    %c0_207 = arith.constant 0 : index
    %243 = vector.load %arg12[%c52, %c0_207] : memref<56x12xf32, #tpu.memory_space<vmem>>, vector<2x12xf32>
    %244 = arith.maximumf %242, %243 : vector<2x12xf32>
    %245 = vector.extract_strided_slice %244 {offsets = [0, 0], sizes = [1, 12], strides = [1, 1]} : vector<2x12xf32> to vector<1x12xf32>
    %246 = vector.extract_strided_slice %244 {offsets = [1, 0], sizes = [1, 12], strides = [1, 1]} : vector<2x12xf32> to vector<1x12xf32>
    %247 = arith.maximumf %245, %246 : vector<1x12xf32>
    %248 = arith.addf %247, %149 : vector<1x12xf32>
    %cst_208 = arith.constant 0.000000e+00 : f32
    %249 = vector.broadcast %cst_208 : f32 to vector<1x12xf32>
    %250 = arith.maximumf %248, %249 : vector<1x12xf32>
    %c7_209 = arith.constant 7 : index
    %c0_210 = arith.constant 0 : index
    %c0_211 = arith.constant 0 : index
    %251 = vector.load %arg6[%c7_209, %c0_210, %c0_211] : memref<9x12x32xf32, #tpu.memory_space<vmem>>, vector<1x12x32xf32>
    %252 = vector.shape_cast %251 : vector<1x12x32xf32> to vector<12x32xf32>
    %cst_212 = arith.constant dense<0.000000e+00> : vector<1x32xf32>
    %253 = tpu.matmul %250, %252, %cst_212 {dimension_numbers = #tpu.dot_dimension_numbers<[1], [0], [0], [1], [0, 0, 1, 1], [], []>} : vector<1x12xf32>, vector<12x32xf32>, vector<1x32xf32> -> vector<1x32xf32>
    %254 = arith.addf %241, %253 : vector<1x32xf32>
    %c44_213 = arith.constant 44 : index
    %c0_214 = arith.constant 0 : index
    %255 = vector.load %arg12[%c44_213, %c0_214] : memref<56x12xf32, #tpu.memory_space<vmem>>, vector<2x12xf32>
    %c54 = arith.constant 54 : index
    %c0_215 = arith.constant 0 : index
    %256 = vector.load %arg12[%c54, %c0_215] : memref<56x12xf32, #tpu.memory_space<vmem>>, vector<2x12xf32>
    %257 = arith.maximumf %255, %256 : vector<2x12xf32>
    %258 = vector.extract_strided_slice %257 {offsets = [0, 0], sizes = [1, 12], strides = [1, 1]} : vector<2x12xf32> to vector<1x12xf32>
    %259 = vector.extract_strided_slice %257 {offsets = [1, 0], sizes = [1, 12], strides = [1, 1]} : vector<2x12xf32> to vector<1x12xf32>
    %260 = arith.maximumf %258, %259 : vector<1x12xf32>
    %261 = arith.addf %260, %149 : vector<1x12xf32>
    %cst_216 = arith.constant 0.000000e+00 : f32
    %262 = vector.broadcast %cst_216 : f32 to vector<1x12xf32>
    %263 = arith.maximumf %261, %262 : vector<1x12xf32>
    %c8_217 = arith.constant 8 : index
    %c0_218 = arith.constant 0 : index
    %c0_219 = arith.constant 0 : index
    %264 = vector.load %arg6[%c8_217, %c0_218, %c0_219] : memref<9x12x32xf32, #tpu.memory_space<vmem>>, vector<1x12x32xf32>
    %265 = vector.shape_cast %264 : vector<1x12x32xf32> to vector<12x32xf32>
    %cst_220 = arith.constant dense<0.000000e+00> : vector<1x32xf32>
    %266 = tpu.matmul %263, %265, %cst_220 {dimension_numbers = #tpu.dot_dimension_numbers<[1], [0], [0], [1], [0, 0, 1, 1], [], []>} : vector<1x12xf32>, vector<12x32xf32>, vector<1x32xf32> -> vector<1x32xf32>
    %267 = arith.addf %254, %266 : vector<1x32xf32>
    %c0_221 = arith.constant 0 : index
    %c0_222 = arith.constant 0 : index
    %268 = vector.load %arg7[%c0_221, %c0_222] : memref<1x32xf32, #tpu.memory_space<vmem>>, vector<1x32xf32>
    %269 = arith.addf %267, %268 : vector<1x32xf32>
    %cst_223 = arith.constant 0.000000e+00 : f32
    %270 = vector.broadcast %cst_223 : f32 to vector<1x32xf32>
    %271 = arith.maximumf %269, %270 : vector<1x32xf32>
    %c0_224 = arith.constant 0 : index
    %c0_225 = arith.constant 0 : index
    %272 = vector.load %arg8[%c0_224, %c0_225] : memref<1x32xf32, #tpu.memory_space<vmem>>, vector<1x32xf32>
    %273 = arith.mulf %271, %272 : vector<1x32xf32>
    %cst_226 = arith.constant dense<0.000000e+00> : vector<1xf32>
    %274 = vector.multi_reduction <add>, %273, %cst_226 [1] : vector<1x32xf32> to vector<1xf32>
    %275 = vector.shape_cast %274 : vector<1xf32> to vector<1x1xf32>
    %c0_227 = arith.constant 0 : index
    %c0_228 = arith.constant 0 : index
    %276 = vector.load %arg9[%c0_227, %c0_228] : memref<1x1xf32, #tpu.memory_space<vmem>>, vector<1x1xf32>
    %277 = arith.addf %275, %276 : vector<1x1xf32>
    %278 = math.absf %277 : vector<1x1xf32>
    %cst_229 = arith.constant 0.000000e+00 : f32
    %279 = vector.broadcast %cst_229 : f32 to vector<1x1xf32>
    %280 = arith.subf %279, %278 : vector<1x1xf32>
    %281 = math.exp %280 : vector<1x1xf32>
    %cst_230 = arith.constant 0.000000e+00 : f32
    %282 = vector.broadcast %cst_230 : f32 to vector<1x1xf32>
    %283 = arith.cmpf oge, %277, %282 : vector<1x1xf32>
    %cst_231 = arith.constant 1.000000e+00 : f32
    %284 = vector.broadcast %cst_231 : f32 to vector<1x1xf32>
    %285 = arith.addf %284, %281 : vector<1x1xf32>
    %cst_232 = arith.constant 1.000000e+00 : f32
    %286 = vector.broadcast %cst_232 : f32 to vector<1x1xf32>
    %287 = arith.divf %286, %285 : vector<1x1xf32>
    %cst_233 = arith.constant 1.000000e+00 : f32
    %288 = vector.broadcast %cst_233 : f32 to vector<1x1xf32>
    %289 = arith.addf %288, %281 : vector<1x1xf32>
    %290 = arith.divf %281, %289 : vector<1x1xf32>
    %291 = arith.select %283, %287, %290 : vector<1x1xi1>, vector<1x1xf32>
    %c0_234 = arith.constant 0 : index
    %c0_235 = arith.constant 0 : index
    %c0_236 = arith.constant 0 : index
    %292 = vector.load %arg10[%c0_234, %c0_235, %c0_236] : memref<1x1x1xf32, #tpu.memory_space<vmem>>, vector<1x1x1xf32>
    %293 = vector.shape_cast %292 : vector<1x1x1xf32> to vector<1x1xf32>
    %294 = vector.shape_cast %291 : vector<1x1xf32> to vector<1x1x1xf32>
    tpu.vector_store %arg10[%c0_234, %c0_235, %c0_236], %294 {strides = array<i32>} : memref<1x1x1xf32, #tpu.memory_space<vmem>>, vector<1x1x1xf32>,
    return
  }
  func.func @transform_0(%arg0: i32) -> (i32, i32, i32) {
    %c0_i32 = arith.constant 0 : i32
    %c0_i32_0 = arith.constant 0 : i32
    %c0_i32_1 = arith.constant 0 : i32
    return %arg0, %c0_i32, %c0_i32_0 : i32, i32, i32
  }
  func.func @transform_1(%arg0: i32) -> (i32, i32) {
    %c0_i32 = arith.constant 0 : i32
    %c0_i32_0 = arith.constant 0 : i32
    %c0_i32_1 = arith.constant 0 : i32
    return %c0_i32, %c0_i32_0 : i32, i32
  }
  func.func @transform_2(%arg0: i32) -> (i32, i32) {
    %c0_i32 = arith.constant 0 : i32
    %c0_i32_0 = arith.constant 0 : i32
    %c0_i32_1 = arith.constant 0 : i32
    return %c0_i32, %c0_i32_0 : i32, i32
  }
  func.func @transform_3(%arg0: i32) -> (i32, i32, i32) {
    %c0_i32 = arith.constant 0 : i32
    %c0_i32_0 = arith.constant 0 : i32
    %c0_i32_1 = arith.constant 0 : i32
    %c0_i32_2 = arith.constant 0 : i32
    return %c0_i32, %c0_i32_0, %c0_i32_1 : i32, i32, i32
  }
  func.func @transform_4(%arg0: i32) -> (i32, i32) {
    %c0_i32 = arith.constant 0 : i32
    %c0_i32_0 = arith.constant 0 : i32
    %c0_i32_1 = arith.constant 0 : i32
    return %c0_i32, %c0_i32_0 : i32, i32
  }
  func.func @transform_5(%arg0: i32) -> (i32, i32, i32) {
    %c0_i32 = arith.constant 0 : i32
    %c0_i32_0 = arith.constant 0 : i32
    %c0_i32_1 = arith.constant 0 : i32
    %c0_i32_2 = arith.constant 0 : i32
    return %c0_i32, %c0_i32_0, %c0_i32_1 : i32, i32, i32
  }
  func.func @transform_6(%arg0: i32) -> (i32, i32) {
    %c0_i32 = arith.constant 0 : i32
    %c0_i32_0 = arith.constant 0 : i32
    %c0_i32_1 = arith.constant 0 : i32
    return %c0_i32, %c0_i32_0 : i32, i32
  }
  func.func @transform_7(%arg0: i32) -> (i32, i32) {
    %c0_i32 = arith.constant 0 : i32
    %c0_i32_0 = arith.constant 0 : i32
    %c0_i32_1 = arith.constant 0 : i32
    return %c0_i32, %c0_i32_0 : i32, i32
  }
  func.func @transform_8(%arg0: i32) -> (i32, i32) {
    %c0_i32 = arith.constant 0 : i32
    %c0_i32_0 = arith.constant 0 : i32
    %c0_i32_1 = arith.constant 0 : i32
    return %c0_i32, %c0_i32_0 : i32, i32
  }
  func.func @transform_9(%arg0: i32) -> (i32, i32, i32) {
    %c0_i32 = arith.constant 0 : i32
    %c0_i32_0 = arith.constant 0 : i32
    %c0_i32_1 = arith.constant 0 : i32
    return %arg0, %c0_i32, %c0_i32_0 : i32, i32, i32
  }
}

</mosaic_0001>

<bundles_post_ra>
// kernel: discriminator_forward.1
= control target key start
LH: loop header
LB: loop body
LE: loop exit
PB: predicated region body
PF: predicated region fallthrough
CT: control target
= control target key end

     0   :  { %s3696_s11 = smov 0   ;;  %s4651_s0 = inlined_call_operand.vmem [shape: f32[8,100,75], index: 0, kind: input, shape index: {}]   ;;  %s4652_s1 = inlined_call_operand.vmem [shape: f32[75,6], index: 1, kind: input, shape index: {}]   ;;  %s4653_s2 = inlined_call_operand.vmem [shape: f32[1,6], index: 2, kind: input, shape index: {}]   ;;  %s4654_s3 = inlined_call_operand.vmem [shape: f32[25,6,12], index: 3, kind: input, shape index: {}]   ;;  %s4655_s4 = inlined_call_operand.vmem [shape: f32[1,12], index: 4, kind: input, shape index: {}]   ;;  %s4656_s5 = inlined_call_operand.vmem [shape: f32[9,12,32], index: 5, kind: input, shape index: {}]   ;;  %s4657_s6 = inlined_call_operand.vmem [shape: f32[1,32], index: 6, kind: input, shape index: {}]   ;;  %s4658_s7 = inlined_call_operand.vmem [shape: f32[1,32], index: 7, kind: input, shape index: {}]   ;;  %s4659_s8 = inlined_call_operand.<no memory space> [shape: f32[1,1], index: 8, kind: input, shape index: {}]   ;;  %s4660_s9 = inlined_call_operand.vmem [shape: f32[2,1,1], index: 9, kind: output, shape index: {}]  }
   0x1   :  { %v14_v0 = vstv %s4659_s8 }
   0x2   :  { %15 = vst [vmem:[#allocation4] sm:$0x1] %v14_v0 }
   0x3 LB: > { %s3702_s12 = sadd.s32 4294967295, %s3641_s11   ;;  %p3251_p0 = scmp.ge.s32.totalorder %s3641_s11, 1  ;;  %s3641_s11 = sphi %s3696_s11, %s21_s11  }
   0x4   : > { %p291_p1 = scmp.lt.s32.totalorder %s3641_s11, 3 }
   0x6   : > { %p292_p2 = pnand %p3251_p0, %p291_p1 }
   0x7   : > { %s3252_s16 = sshll.u32 (!%p292_p2), %s3702_s12, 2  ;;  %p333_p4 = scmp.lt.s32.totalorder (!%p292_p2), %s3702_s12, 1 }
   0x8   : > { %295 = sbr.rel (%p292_p2) target bundleno = 1037 (0x40d), region = 56  ;;  %p327_p3 = scmp.lt.s32.totalorder (!%p292_p2), %s3252_s16, 7 }
   0xd   : > { %v345_v1 = vld [vmem:[%s4652_s1 + $0x48] sm:$0x7]  ;;  %vm399_vm0 = vcmask 1042432   ;;  %v344_v2 = vld [vmem:[%s4652_s1 + $0x40] sm:$0xff]  ;;  %v343_v3 = vld [vmem:[%s4652_s1 + $0x38] sm:$0xff]  ;;  %s4662_s16 = smov (!%p327_p3, %s3252_s16), 7 }
   0xe   : > { %3609 = vmatpush.msk.msra.mxu1 %vm399_vm0, %v345_v1  ;;  %3308 = vmatpush.msk.msra.mxu2 %vm399_vm0, %v345_v1  ;;  %v342_v4 = vld [vmem:[%s4652_s1 + $0x30] sm:$0xff]  ;;  %v341_v5 = vld [vmem:[%s4652_s1 + $0x28] sm:$0xff]  ;;  %v340_v6 = vld [vmem:[%s4652_s1 + $0x20] sm:$0xff]  ;;  %s3621_s27 = smul.u32 104, %s4662_s16  ;;  %vm359_vm1 = vcmask 613376   ;;  %vm908_vm2 = vcmask 1045504  }
   0xf   : > { %3335 = vmatpush.msk.msra.mxu3 %vm399_vm0, %v345_v1  ;;  %3254 = vmatpush.msk.msra.mxu0 %vm399_vm0, %v345_v1  ;;  %v339_v7 = vld [vmem:[%s4652_s1 + $0x18] sm:$0xff]  ;;  %v338_v8 = vld [vmem:[%s4652_s1 + $0x10] sm:$0xff]  ;;  %v337_v9 = vld [vmem:[%s4652_s1 + $0x8] sm:$0xff]  ;;  %vm855_vm3 = vcmask 48128   ;;  %vm868_vm4 = vcmask 44032   ;;  %vm2841_vm5 = vcmask 1043456  }
  0x10   : > { %3610 = vmatpush.msra.mxu1 %v344_v2  ;;  %641 = vmatpush.msra.mxu2 %v344_v2  ;;  %s3741_s8 = scalar_lea.vmem %s4651_s0, %s3621_s27  ;;  %v336_v10 = vld [vmem:[%s4652_s1] sm:$0xff]  ;;  %v3349_v47 = vld [vmem:[%s4654_s3 + $0x8] sm:$0x3f]  ;;  %vm2806_vm6 = vcmask 97280   ;;  %vm3169_vm7 = vcmask 253952   ;;  %s4664_s12 = smov (!%p333_p4, %s3702_s12), 1 }
  0x11   : > { %763 = vmatpush.msra.mxu3 %v344_v2  ;;  %410 = vmatpush.msra.mxu0 %v344_v2  ;;  %v356_v11 = vld [vmem:[%s3741_s8 + $0x50] sm:$0xff]  ;;  %v3322_v13 = vld [vmem:[%s3741_s8 + $0x138] sm:$0xff]  ;;  %v346_v14 = vld [vmem:[%s3741_s8] sm:$0xff]  ;;  %s335_s14 = scalar_lea.vmem %s4660_s9, %s4664_s12  ;;  %vm3198_vm12 = vcmask 0  }
  0x12   : > { %3611 = vmatpush.msra.mxu1 %v343_v3  ;;  %642 = vmatpush.msra.mxu2 %v343_v3  ;;  %v3295_v12 = vld [vmem:[%s3741_s8 + $0xd0] sm:$0xff]  ;;  %v357_v15 = vld [vmem:[%s3741_s8 + $0x58] sm:$0xff]  ;;  %v3323_v17 = vld [vmem:[%s3741_s8 + $0x140] sm:$0xff] }
  0x13   : > { %764 = vmatpush.msra.mxu3 %v343_v3  ;;  %411 = vmatpush.msra.mxu0 %v343_v3  ;;  %v3296_v16 = vld [vmem:[%s3741_s8 + $0xd8] sm:$0xff]  ;;  %v347_v18 = vld [vmem:[%s3741_s8 + $0x8] sm:$0xff]  ;;  %v358_v19 = vld [vmem:[%s3741_s8 + $0x60] sm:$0xf] }
  0x14   : > { %3612 = vmatpush.msra.mxu1 %v342_v4  ;;  %643 = vmatpush.msra.mxu2 %v342_v4  ;;  %v3297_v20 = vld [vmem:[%s3741_s8 + $0xe0] sm:$0xff]  ;;  %v3324_v21 = vld [vmem:[%s3741_s8 + $0x148] sm:$0xff]  ;;  %v348_v22 = vld [vmem:[%s3741_s8 + $0x10] sm:$0xff] }
  0x15   : > { %765 = vmatpush.msra.mxu3 %v342_v4  ;;  %412 = vmatpush.msra.mxu0 %v342_v4  ;;  %v3268_v23 = vld [vmem:[%s3741_s8 + $0x68] sm:$0xff]  ;;  %v3325_v25 = vld [vmem:[%s3741_s8 + $0x150] sm:$0xff]  ;;  %v349_v26 = vld [vmem:[%s3741_s8 + $0x18] sm:$0xff] }
  0x16   : > { %3613 = vmatpush.msra.mxu1 %v341_v5  ;;  %644 = vmatpush.msra.mxu2 %v341_v5  ;;  %v3298_v24 = vld [vmem:[%s3741_s8 + $0xe8] sm:$0xff]  ;;  %v3269_v27 = vld [vmem:[%s3741_s8 + $0x70] sm:$0xff]  ;;  %v3326_v29 = vld [vmem:[%s3741_s8 + $0x158] sm:$0xff] }
  0x17   : > { %766 = vmatpush.msra.mxu3 %v341_v5  ;;  %413 = vmatpush.msra.mxu0 %v341_v5  ;;  %v3299_v28 = vld [vmem:[%s3741_s8 + $0xf0] sm:$0xff]  ;;  %v350_v30 = vld [vmem:[%s3741_s8 + $0x20] sm:$0xff]  ;;  %v3270_v31 = vld [vmem:[%s3741_s8 + $0x78] sm:$0xff] }
  0x18   : > { %3614 = vmatpush.msra.mxu1 %v340_v6  ;;  %645 = vmatpush.msra.mxu2 %v340_v6  ;;  %v3300_v32 = vld [vmem:[%s3741_s8 + $0xf8] sm:$0xff]  ;;  %v3327_v33 = vld [vmem:[%s3741_s8 + $0x160] sm:$0xff]  ;;  %v351_v34 = vld [vmem:[%s3741_s8 + $0x28] sm:$0xff] }
  0x19   : > { %767 = vmatpush.msra.mxu3 %v340_v6  ;;  %414 = vmatpush.msra.mxu0 %v340_v6  ;;  %v3271_v35 = vld [vmem:[%s3741_s8 + $0x80] sm:$0xff]  ;;  %v3328_v37 = vld [vmem:[%s3741_s8 + $0x168] sm:$0xff]  ;;  %v352_v38 = vld [vmem:[%s3741_s8 + $0x30] sm:$0xff] }
  0x1a   : > { %3615 = vmatpush.msra.mxu1 %v339_v7  ;;  %646 = vmatpush.msra.mxu2 %v339_v7  ;;  %v3301_v36 = vld [vmem:[%s3741_s8 + $0x100] sm:$0xff]  ;;  %v3272_v39 = vld [vmem:[%s3741_s8 + $0x88] sm:$0xff]  ;;  %v3329_v41 = vld [vmem:[%s3741_s8 + $0x170] sm:$0xff] }
  0x1b   : > { %768 = vmatpush.msra.mxu3 %v339_v7  ;;  %415 = vmatpush.msra.mxu0 %v339_v7  ;;  %v3302_v40 = vld [vmem:[%s3741_s8 + $0x108] sm:$0xff]  ;;  %v353_v42 = vld [vmem:[%s3741_s8 + $0x38] sm:$0xff]  ;;  %v3273_v43 = vld [vmem:[%s3741_s8 + $0x90] sm:$0xff] }
  0x1c   : > { %3616 = vmatpush.msra.mxu1 %v338_v8  ;;  %647 = vmatpush.msra.mxu2 %v338_v8  ;;  %v3303_v44 = vld [vmem:[%s3741_s8 + $0x110] sm:$0xff]  ;;  %v3330_v45 = vld [vmem:[%s3741_s8 + $0x178] sm:$0xff]  ;;  %v354_v46 = vld [vmem:[%s3741_s8 + $0x40] sm:$0xff] }
  0x1d   : > { %769 = vmatpush.msra.mxu3 %v338_v8  ;;  %416 = vmatpush.msra.mxu0 %v338_v8  ;;  %v3274_v48 = vld [vmem:[%s3741_s8 + $0x98] sm:$0xff]  ;;  %v3331_v50 = vld [vmem:[%s3741_s8 + $0x180] sm:$0xff]  ;;  %v355_v51 = vld [vmem:[%s3741_s8 + $0x48] sm:$0xff] }
  0x1e   : > { %3617 = vmatpush.msra.mxu1 %v337_v9  ;;  %648 = vmatpush.msra.mxu2 %v337_v9  ;;  %v3304_v49 = vld [vmem:[%s3741_s8 + $0x118] sm:$0xff]  ;;  %v877_v52 = vld [vmem:[%s4654_s3] sm:$0x3f]  ;;  %v3332_v55 = vld [vmem:[%s3741_s8 + $0x188] sm:$0xff] }
  0x1f   : > { %770 = vmatpush.msra.mxu3 %v337_v9  ;;  %417 = vmatpush.msra.mxu0 %v337_v9  ;;  %v3275_v53 = vld [vmem:[%s3741_s8 + $0xa0] sm:$0xff]  ;;  %v3276_v56 = vld [vmem:[%s3741_s8 + $0xa8] sm:$0xff]  ;;  %v3333_v58 = vld [vmem:[%s3741_s8 + $0x190] sm:$0xff] }
  0x20   : > { %3618 = vmatpush.msra.mxu1 %v336_v10  ;;  %649 = vmatpush.msra.mxu2 %v336_v10  ;;  %v3305_v54 = vld [vmem:[%s3741_s8 + $0x120] sm:$0xff]  ;;  %v3306_v57 = vld [vmem:[%s3741_s8 + $0x128] sm:$0xff]  ;;  %v3277_v59 = vld [vmem:[%s3741_s8 + $0xb0] sm:$0xff] }
  0x21   : > { %3265 = vmatmul.msk.f32.vlgmr.msra.gmra.mxu1 %vm359_vm1, %v356_v11  ;;  %3309 = vmatmul.msk.f32.vlgmr.msra.gmra.mxu2 %vm359_vm1, %v3295_v12  ;;  %v3307_v60 = vld [vmem:[%s3741_s8 + $0x130] sm:$0xf]  ;;  %v3334_v61 = vld [vmem:[%s3741_s8 + $0x198] sm:$0xf]  ;;  %v3279_v63 = vld [vmem:[%s3741_s8 + $0xc0] sm:$0xff] }
  0x22   : > { %3281 = vmatpush.msk.msrb.mxu1 %vm399_vm0, %v345_v1  ;;  %771 = vmatpush.msra.mxu3 %v336_v10  ;;  %v3278_v62 = vld [vmem:[%s3741_s8 + $0xb8] sm:$0xff]  ;;  %v3280_v0 = vld [vmem:[%s3741_s8 + $0xc8] sm:$0xf] }
  0x23   : > { %3336 = vmatmul.msk.f32.vlgmr.msra.gmra.mxu3 %vm359_vm1, %v3322_v13  ;;  %418 = vmatpush.msra.mxu0 %v336_v10 }
  0x24   : > { %519 = vmatpush.msrb.mxu1 %v344_v2  ;;  %3255 = vmatmul.msk.f32.vlgmr.msra.gmra.mxu0 %vm359_vm1, %v346_v14 }
  0x25   : > { %3350 = vmatpush.msk.msrb.mxu0 %vm908_vm2, %v3349_v47  ;;  %3619 = vmatpush.msk.msrb.mxu2 %vm908_vm2, %v877_v52 }
  0x26   : > { %520 = vmatpush.msrb.mxu1 %v343_v3  ;;  %3620 = vmatpush.msk.msrb.mxu3 %vm908_vm2, %v877_v52 }
  0x28   : > { %521 = vmatpush.msrb.mxu1 %v342_v4 }
  0x29   : > { %3266 = vmatmul.msk.f32.gmra.mxu1 %vm359_vm1, %v357_v15  ;;  %3310 = vmatmul.msk.f32.gmra.mxu2 %vm359_vm1, %v3296_v16 }
  0x2a   : > { %522 = vmatpush.msrb.mxu1 %v341_v5 }
  0x2b   : > { %3337 = vmatmul.msk.f32.gmra.mxu3 %vm359_vm1, %v3323_v17  ;;  %v3874_v17 = vld [vmem:[%s4653_s2] ss:$0 sm:$0xff] }
  0x2c   : > { %523 = vmatpush.msrb.mxu1 %v340_v6  ;;  %3256 = vmatmul.msk.f32.gmra.mxu0 %vm359_vm1, %v347_v18 }
  0x2e   : > { %524 = vmatpush.msrb.mxu1 %v339_v7 }
  0x30   : > { %525 = vmatpush.msrb.mxu1 %v338_v8 }
  0x31   : > { %3267 = vmatmul.msk.f32.gmra.mxu1 %vm359_vm1, %v358_v19  ;;  %3311 = vmatmul.msk.f32.gmra.mxu2 %vm359_vm1, %v3297_v20 }
  0x32   : > { %526 = vmatpush.msrb.mxu1 %v337_v9 }
  0x33   : > { %3338 = vmatmul.msk.f32.gmra.mxu3 %vm359_vm1, %v3324_v21 }
  0x34   : > { %527 = vmatpush.msrb.mxu1 %v336_v10  ;;  %3257 = vmatmul.msk.f32.gmra.mxu0 %vm359_vm1, %v348_v22  ;;  %v3384_v10 = vld [vmem:[%s4654_s3 + $0x20] sm:$0x3f] }
  0x35   : > { %3385 = vmatpush.msk.msra.mxu0 %vm908_vm2, %v3384_v10 }
  0x36   : > { %3358 = vmatpush.msk.msra.mxu1 %vm908_vm2, %v877_v52 }
  0x39   : > { %3282 = vmatmul.msk.f32.vlgmr.msrb.gmra.mxu1 %vm359_vm1, %v3268_v23  ;;  %3312 = vmatmul.msk.f32.gmra.mxu2 %vm359_vm1, %v3298_v24 }
  0x3b   : > { %3339 = vmatmul.msk.f32.gmra.mxu3 %vm359_vm1, %v3325_v25 }
  0x3c   : > { %3258 = vmatmul.msk.f32.gmra.mxu0 %vm359_vm1, %v349_v26 }
  0x41   : > { %3283 = vmatmul.msk.f32.gmra.mxu1 %vm359_vm1, %v3269_v27  ;;  %3313 = vmatmul.msk.f32.gmra.mxu2 %vm359_vm1, %v3299_v28 }
  0x43   : > { %3340 = vmatmul.msk.f32.gmra.mxu3 %vm359_vm1, %v3326_v29 }
  0x44   : > { %3259 = vmatmul.msk.f32.gmra.mxu0 %vm359_vm1, %v350_v30 }
  0x49   : > { %3284 = vmatmul.msk.f32.gmra.mxu1 %vm359_vm1, %v3270_v31  ;;  %3314 = vmatmul.msk.f32.gmra.mxu2 %vm359_vm1, %v3300_v32 }
  0x4b   : > { %3341 = vmatmul.msk.f32.gmra.mxu3 %vm359_vm1, %v3327_v33 }
  0x4c   : > { %3260 = vmatmul.msk.f32.gmra.mxu0 %vm359_vm1, %v351_v34 }
  0x51   : > { %3285 = vmatmul.msk.f32.gmra.mxu1 %vm359_vm1, %v3271_v35  ;;  %3315 = vmatmul.msk.f32.gmra.mxu2 %vm359_vm1, %v3301_v36 }
  0x53   : > { %3342 = vmatmul.msk.f32.gmra.mxu3 %vm359_vm1, %v3328_v37 }
  0x54   : > { %3261 = vmatmul.msk.f32.gmra.mxu0 %vm359_vm1, %v352_v38 }
  0x59   : > { %3286 = vmatmul.msk.f32.gmra.mxu1 %vm359_vm1, %v3272_v39  ;;  %3316 = vmatmul.msk.f32.gmra.mxu2 %vm359_vm1, %v3302_v40 }
  0x5b   : > { %3343 = vmatmul.msk.f32.gmra.mxu3 %vm359_vm1, %v3329_v41 }
  0x5c   : > { %3262 = vmatmul.msk.f32.gmra.mxu0 %vm359_vm1, %v353_v42  ;;  %v3393_v42 = vld [vmem:[%s4654_s3 + $0x28] sm:$0x3f] }
  0x5d   : > { %3394 = vmatpush.msk.msrb.mxu1 %vm908_vm2, %v3393_v42 }
  0x61   : > { %3287 = vmatmul.msk.f32.gmra.mxu1 %vm359_vm1, %v3273_v43  ;;  %3317 = vmatmul.msk.f32.gmra.mxu2 %vm359_vm1, %v3303_v44 }
  0x63   : > { %3344 = vmatmul.msk.f32.gmra.mxu3 %vm359_vm1, %v3330_v45 }
  0x64   : > { %3263 = vmatmul.msk.f32.gmra.mxu0 %vm359_vm1, %v354_v46 }
  0x69   : > { %3288 = vmatmul.msk.f32.gmra.mxu1 %vm359_vm1, %v3274_v48  ;;  %3318 = vmatmul.msk.f32.gmra.mxu2 %vm359_vm1, %v3304_v49 }
  0x6b   : > { %3345 = vmatmul.msk.f32.gmra.mxu3 %vm359_vm1, %v3331_v50 }
  0x6c   : > { %3264 = vmatmul.msk.f32.gmra.mxu0 %vm359_vm1, %v355_v51 }
  0x71   : > { %3289 = vmatmul.msk.f32.gmra.mxu1 %vm359_vm1, %v3275_v53  ;;  %3319 = vmatmul.msk.f32.gmra.mxu2 %vm359_vm1, %v3305_v54 }
  0x73   : > { %3346 = vmatmul.msk.f32.gmra.mxu3 %vm359_vm1, %v3332_v55 }
  0x79   : > { %3290 = vmatmul.msk.f32.gmra.mxu1 %vm359_vm1, %v3276_v56  ;;  %3320 = vmatmul.msk.f32.gmra.mxu2 %vm359_vm1, %v3306_v57  ;;  %v3366_v57 = vld [vmem:[%s4654_s3 + $0x10] sm:$0x3f] }
  0x7a   : > { %3367 = vmatpush.msk.msra.mxu2 %vm908_vm2, %v3366_v57 }
  0x7b   : > { %3347 = vmatmul.msk.f32.gmra.mxu3 %vm359_vm1, %v3333_v58 }
  0x81   : > { %3291 = vmatmul.msk.f32.gmra.mxu1 %vm359_vm1, %v3277_v59  ;;  %3321 = vmatmul.msk.f32.gmra.mxu2 %vm359_vm1, %v3307_v60  ;;  %v3375_v59 = vld [vmem:[%s4654_s3 + $0x18] sm:$0x3f] }
  0x82   : > { %3376 = vmatpush.msk.msra.mxu3 %vm908_vm2, %v3375_v59  ;;  %v3429_v59 = vld [vmem:[%s4654_s3 + $0x48] sm:$0x3f] }
  0x83   : > { %3348 = vmatmul.msk.f32.gmra.mxu3 %vm359_vm1, %v3334_v61 }
  0x89   : > { %3292 = vmatmul.msk.f32.gmra.mxu1 %vm359_vm1, %v3278_v62 }
  0x91   : > { %3293 = vmatmul.msk.f32.gmra.mxu1 %vm359_vm1, %v3279_v63 }
  0x99   : > { %3294 = vmatmul.msk.f32.gmra.mxu1 %vm359_vm1, %v3280_v0 }
  0x9e   : > { %v3861_v1 = vpop.f32.mrf.mxu1 }
  0xa1   : > { %v420_v2 = vpop.f32.mrf.mxu0 }
  0xa4   : > { %v651_v3 = vpop.f32.mrf.mxu2 }
  0xa6   : > { %v3863_v4 = vpop.f32.mrf.mxu1  ;;  %v773_v5 = vpop.f32.mrf.mxu3 }
  0xa9   : > { %v423_v7 = vpop.f32.mrf.mxu0 }
  0xac   : > { %v654_v6 = vpop.f32.mrf.mxu2 }
  0xae   : > { %v3865_v8 = vpop.f32.mrf.mxu1  ;;  %v776_v9 = vpop.f32.mrf.mxu3 }
  0xb1   : > { %v426_v15 = vpop.f32.mrf.mxu0 }
  0xb4   : > { %v657_v11 = vpop.f32.mrf.mxu2 }
  0xb6   : > { %v529_v12 = vpop.f32.mrf.mxu1  ;;  %v779_v13 = vpop.f32.mrf.mxu3 }
  0xb7   : > { %v568_v14 = vmax.f32 %v420_v2, %v529_v12 }
  0xb9   : > { %v690_v16 = vmax.f32 %v568_v14, %v651_v3  ;;  %v429_v26 = vpop.f32.mrf.mxu0 }
  0xbb   : > { %v812_v18 = vmax.f32 %v690_v16, %v773_v5 }
  0xbc   : > { %v660_v19 = vpop.f32.mrf.mxu2 }
  0xbd   : > { %v829_v20 = vadd.f32 %v3874_v17, %v812_v18 }
  0xbe   : > { %v532_v21 = vpop.f32.mrf.mxu1  ;;  %v782_v22 = vpop.f32.mrf.mxu3 }
  0xbf   : > { %v842_v23 = vmax.f32 %v829_v20, 0.0  ;;  %v569_v24 = vmax.f32 %v423_v7, %v532_v21  ;;  %v3420_v21 = vld [vmem:[%s4654_s3 + $0x40] sm:$0x3f] }
  0xc1   : > { %856 = vst.msk [vmem:[#allocation2] sm:$0xff] %vm855_vm3, %v842_v23  ;;  %v691_v25 = vmax.f32 %v569_v24, %v654_v6  ;;  %v432_v37 = vpop.f32.mrf.mxu0 }
  0xc3   : > { %v813_v27 = vmax.f32 %v691_v25, %v776_v9 }
  0xc4   : > { %v663_v30 = vpop.f32.mrf.mxu2 }
  0xc5   : > { %v830_v28 = vadd.f32 %v3874_v17, %v813_v27 }
  0xc6   : > { %v535_v29 = vpop.f32.mrf.mxu1  ;;  %v785_v34 = vpop.f32.mrf.mxu3 }
  0xc7   : > { %v843_v31 = vmax.f32 %v830_v28, 0.0  ;;  %v570_v32 = vmax.f32 %v426_v15, %v535_v29  ;;  %v3402_v28 = vld [vmem:[%s4654_s3 + $0x30] sm:$0x3f] }
  0xc8   : > { %v870_v33 = vld [vmem:[#allocation2] sm:$0xff] }
  0xc9   : > { %857 = vst.msk [vmem:[#allocation2 + $0x8] sm:$0xff] %vm855_vm3, %v843_v31  ;;  %v692_v35 = vmax.f32 %v570_v32, %v657_v11  ;;  %3359 = vmatmul.msk.f32.vlgmr.msra.gmra.mxu1 %vm855_vm3, %v870_v33  ;;  %v435_v51 = vpop.f32.mrf.mxu0 }
  0xca   : > { %3430 = vmatpush.msk.msra.mxu1 %vm908_vm2, %v3429_v59 }
  0xcb   : > { %v814_v36 = vmax.f32 %v692_v35, %v779_v13 }
  0xcc   : > { %v666_v45 = vpop.f32.mrf.mxu2 }
  0xcd   : > { %v831_v38 = vadd.f32 %v3874_v17, %v814_v36 }
  0xce   : > { %v538_v39 = vpop.f32.mrf.mxu1  ;;  %v788_v47 = vpop.f32.mrf.mxu3 }
  0xcf   : > { %v844_v40 = vmax.f32 %v831_v38, 0.0  ;;  %v571_v41 = vmax.f32 %v429_v26, %v538_v39 }
  0xd0   : > { %v878_v43 = vld [vmem:[#allocation2 + $0x1] sm:$0xff] }
  0xd1   : > { %v871_v44 = vld [vmem:[#allocation2 + $0x8] sm:$0xff]  ;;  %858 = vst.msk [vmem:[#allocation2 + $0x10] sm:$0xff] %vm855_vm3, %v844_v40  ;;  %v693_v46 = vmax.f32 %v571_v41, %v660_v19  ;;  %3351 = vmatmul.msk.f32.vlgmr.msrb.gmra.mxu0 %vm855_vm3, %v878_v43  ;;  %v438_v6 = vpop.f32.mrf.mxu0  ;;  %v3411_v43 = vld [vmem:[%s4654_s3 + $0x38] sm:$0x3f] }
  0xd2   : > { %3360 = vmatmul.msk.f32.gmra.mxu1 %vm855_vm3, %v871_v44  ;;  %3421 = vmatpush.msk.msrb.mxu0 %vm908_vm2, %v3420_v21 }
  0xd3   : > { %v815_v48 = vmax.f32 %v693_v46, %v782_v22 }
  0xd4   : > { %v669_v58 = vpop.f32.mrf.mxu2 }
  0xd5   : > { %v832_v49 = vadd.f32 %v3874_v17, %v815_v48 }
  0xd6   : > { %v541_v50 = vpop.f32.mrf.mxu1  ;;  %v791_v61 = vpop.f32.mrf.mxu3 }
  0xd7   : > { %v845_v52 = vmax.f32 %v832_v49, 0.0  ;;  %v572_v53 = vmax.f32 %v432_v37, %v541_v50 }
  0xd8   : > { %v879_v54 = vld [vmem:[#allocation2 + $0x9] sm:$0xff] }
  0xd9   : > { %v872_v55 = vld [vmem:[#allocation2 + $0x10] sm:$0xff]  ;;  %859 = vst.msk [vmem:[#allocation2 + $0x18] sm:$0xff] %vm855_vm3, %v845_v52  ;;  %v694_v56 = vmax.f32 %v572_v53, %v663_v30  ;;  %3352 = vmatmul.msk.f32.gmra.mxu0 %vm855_vm3, %v879_v54  ;;  %v441_v20 = vpop.f32.mrf.mxu0 }
  0xda   : > { %3361 = vmatmul.msk.f32.gmra.mxu1 %vm855_vm3, %v872_v55  ;;  %v1246_v33 = vld [vmem:[#allocation2 + $0xa] sm:$0xff] }
  0xdb   : > { %v816_v60 = vmax.f32 %v694_v56, %v785_v34  ;;  %v1090_v55 = vld [vmem:[#allocation2 + $0x3] sm:$0xff] }
  0xdc   : > { %v672_v10 = vpop.f32.mrf.mxu2 }
  0xdd   : > { %v833_v62 = vadd.f32 %v3874_v17, %v816_v60 }
  0xde   : > { %v544_v63 = vpop.f32.mrf.mxu1  ;;  %v794_v13 = vpop.f32.mrf.mxu3 }
  0xdf   : > { %v846_v0 = vmax.f32 %v833_v62, 0.0  ;;  %v573_v2 = vmax.f32 %v435_v51, %v544_v63 }
  0xe0   : > { %v880_v3 = vld [vmem:[#allocation2 + $0x11] sm:$0xff] }
  0xe1   : > { %v3902_v5 = vld [vmem:[#allocation2 + $0x18] sm:$0xff]  ;;  %860 = vst.msk [vmem:[#allocation2 + $0x20] sm:$0xff] %vm855_vm3, %v846_v0  ;;  %v695_v7 = vmax.f32 %v573_v2, %v666_v45  ;;  %3353 = vmatmul.msk.f32.gmra.mxu0 %vm855_vm3, %v880_v3  ;;  %v444_v35 = vpop.f32.mrf.mxu0  ;;  %v1012_v45 = vld [vmem:[#allocation2 + $0x2] sm:$0xff]  ;;  %v3965_v3 = vld [vmem:[#allocation2 + $0xb] sm:$0xff] }
  0xe2   : > { %3362 = vmatmul.msk.f32.gmra.mxu1 %vm855_vm3, %v3902_v5  ;;  %v1247_v46 = vld [vmem:[#allocation2 + $0x12] sm:$0xff] }
  0xe3   : > { %v817_v9 = vmax.f32 %v695_v7, %v788_v47 }
  0xe4   : > { %v675_v25 = vpop.f32.mrf.mxu2 }
  0xe5   : > { %v834_v11 = vadd.f32 %v3874_v17, %v817_v9 }
  0xe6   : > { %v547_v12 = vpop.f32.mrf.mxu1  ;;  %v797_v31 = vpop.f32.mrf.mxu3 }
  0xe7   : > { %v847_v14 = vmax.f32 %v834_v11, 0.0  ;;  %v574_v15 = vmax.f32 %v438_v6, %v547_v12  ;;  %v1168_v6 = vld [vmem:[#allocation2 + $0x4] sm:$0xff] }
  0xe8   : > { %v881_v16 = vld [vmem:[#allocation2 + $0x19] sm:$0xff] }
  0xe9   : > { %v3909_v18 = vld [vmem:[#allocation2 + $0x20] sm:$0xff]  ;;  %861 = vst.msk [vmem:[#allocation2 + $0x28] sm:$0xff] %vm855_vm3, %v847_v14  ;;  %v696_v19 = vmax.f32 %v574_v15, %v669_v58  ;;  %3354 = vmatmul.msk.f32.gmra.mxu0 %vm855_vm3, %v881_v16  ;;  %v447_v49 = vpop.f32.mrf.mxu0  ;;  %v1092_v16 = vld [vmem:[#allocation2 + $0x13] sm:$0xff] }
  0xea   : > { %3363 = vmatmul.msk.f32.gmra.mxu1 %vm855_vm3, %v3909_v18  ;;  %v1248_v56 = vld [vmem:[#allocation2 + $0x1a] sm:$0xff] }
  0xeb   : > { %v818_v22 = vmax.f32 %v696_v19, %v791_v61  ;;  %v1169_v19 = vld [vmem:[#allocation2 + $0xc] sm:$0xff] }
  0xec   : > { %v678_v42 = vpop.f32.mrf.mxu2 }
  0xed   : > { %v835_v23 = vadd.f32 %v3874_v17, %v818_v22 }
  0xee   : > { %v550_v24 = vpop.f32.mrf.mxu1  ;;  %v800_v47 = vpop.f32.mrf.mxu3 }
  0xef   : > { %v848_v26 = vmax.f32 %v835_v23, 0.0  ;;  %v575_v27 = vmax.f32 %v441_v20, %v550_v24 }
  0xf0   : > { %v3923_v29 = vld [vmem:[#allocation2 + $0x21] sm:$0xff] }
  0xf1   : > { %v3925_v30 = vld [vmem:[#allocation2 + $0x28] sm:$0xff]  ;;  %862 = vst.msk [vmem:[#allocation2 + $0x30] sm:$0xff] %vm855_vm3, %v848_v26  ;;  %v697_v32 = vmax.f32 %v575_v27, %v672_v10  ;;  %3355 = vmatmul.msk.f32.gmra.mxu0 %vm855_vm3, %v3923_v29 }
  0xf2   : > { %3364 = vmatmul.msk.f32.vlgmr.msrb.gmra.mxu2 %vm855_vm3, %v3925_v30  ;;  %3395 = vmatmul.msk.f32.vlgmr.msrb.gmra.mxu1 %vm855_vm3, %v1246_v33  ;;  %v3971_v9 = vld [vmem:[#allocation2 + $0x22] sm:$0xff] }
  0xf3   : > { %3403 = vmatpush.msk.msrb.mxu2 %vm908_vm2, %v3402_v28  ;;  %v819_v34 = vmax.f32 %v697_v32, %v794_v13  ;;  %v1093_v28 = vld [vmem:[#allocation2 + $0x1b] sm:$0xff] }
  0xf4   : > { %v681_v58 = vpop.f32.mrf.mxu2 }
  0xf5   : > { %v836_v36 = vadd.f32 %v3874_v17, %v819_v34 }
  0xf6   : > { %v553_v37 = vpop.f32.mrf.mxu1  ;;  %v803_v61 = vpop.f32.mrf.mxu3 }
  0xf7   : > { %v849_v38 = vmax.f32 %v836_v36, 0.0  ;;  %v576_v39 = vmax.f32 %v444_v35, %v553_v37 }
  0xf8   : > { %v3935_v40 = vld [vmem:[#allocation2 + $0x29] sm:$0xff] }
  0xf9   : > { %v3937_v41 = vld [vmem:[#allocation2 + $0x30] sm:$0xff]  ;;  %863 = vst.msk [vmem:[#allocation2 + $0x38] sm:$0xff] %vm855_vm3, %v849_v38  ;;  %v698_v44 = vmax.f32 %v576_v39, %v675_v25  ;;  %3356 = vmatmul.msk.f32.gmra.mxu0 %vm855_vm3, %v3935_v40  ;;  %v1094_v38 = vld [vmem:[#allocation2 + $0x23] sm:$0xff] }
  0xfa   : > { %3365 = vmatmul.msk.f32.vlgmr.msrb.gmra.mxu3 %vm855_vm3, %v3937_v41  ;;  %3368 = vmatmul.msk.f32.vlgmr.msra.gmra.mxu2 %vm855_vm3, %v1012_v45  ;;  %v3981_v21 = vld [vmem:[#allocation2 + $0x2a] sm:$0xff]  ;;  %v4009_v39 = vld [vmem:[#allocation2 + $0x1c] sm:$0xff] }
  0xfb   : > { %3396 = vmatmul.msk.f32.gmra.mxu1 %vm855_vm3, %v1247_v46  ;;  %v820_v48 = vmax.f32 %v698_v44, %v797_v31  ;;  %3412 = vmatpush.msk.msrb.mxu3 %vm908_vm2, %v3411_v43  ;;  %v3992_v31 = vld [vmem:[#allocation2 + $0x14] sm:$0xff]  ;;  %v4024_v43 = vld [vmem:[#allocation2 + $0x2b] sm:$0xff] }
  0xfc   : > { %v4026_v44 = vld [vmem:[#allocation2 + $0x24] sm:$0xff]  ;;  %v1558_v45 = vld [vmem:[#allocation2 + $0xe] sm:$0xff] }
  0xfd   : > { %v837_v50 = vadd.f32 %v3874_v17, %v820_v48  ;;  %v4043_v48 = vld [vmem:[#allocation2 + $0x16] sm:$0xff] }
  0xfe   : > { %v556_v51 = vpop.f32.mrf.mxu1  ;;  %v806_v13 = vpop.f32.mrf.mxu3 }
  0xff   : > { %v850_v52 = vmax.f32 %v837_v50, 0.0  ;;  %v577_v53 = vmax.f32 %v447_v49, %v556_v51  ;;  %v4054_v50 = vld [vmem:[#allocation2 + $0x1e] sm:$0xff]  ;;  %v3465_v51 = vld [vmem:[%s4654_s3 + $0x68] sm:$0x3f] }
 0x100   : > { %v3951_v54 = vld [vmem:[#allocation2 + $0x31] sm:$0xff]  ;;  %3466 = vmatpush.msk.msrb.mxu1 %vm908_vm2, %v3465_v51 }
 0x101   : > { %864 = vst.msk [vmem:[#allocation2 + $0x40] sm:$0xff] %vm855_vm3, %v850_v52  ;;  %3357 = vmatmul.msk.f32.gmra.mxu0 %vm855_vm3, %v3951_v54  ;;  %v699_v57 = vmax.f32 %v577_v53, %v678_v42  ;;  %v3998_v34 = vld [vmem:[#allocation2 + $0x32] sm:$0xff]  ;;  %v4066_v53 = vld [vmem:[#allocation2 + $0x26] sm:$0xff] }
 0x102   : > { %3377 = vmatmul.msk.f32.vlgmr.msra.gmra.mxu3 %vm855_vm3, %v1090_v55  ;;  %3369 = vmatmul.msk.f32.gmra.mxu2 %vm855_vm3, %v1246_v33  ;;  %v4049_v49 = vld [vmem:[#allocation2 + $0x34] sm:$0xff] }
 0x103   : > { %3397 = vmatmul.msk.f32.gmra.mxu1 %vm855_vm3, %v1248_v56  ;;  %v821_v60 = vmax.f32 %v699_v57, %v800_v47  ;;  %v4037_v47 = vld [vmem:[#allocation2 + $0x2c] sm:$0xff] }
 0x104   : > { %v1480_v52 = vld [vmem:[#allocation2 + $0xd] sm:$0xff] }
 0x105   : > { %v838_v62 = vadd.f32 %v3874_v17, %v821_v60  ;;  %v4076_v57 = vld [vmem:[#allocation2 + $0x2e] sm:$0xff] }
 0x106   : > { %v559_v63 = vpop.f32.mrf.mxu1  ;;  %v809_v32 = vpop.f32.mrf.mxu3  ;;  %v3474_v60 = vld [vmem:[%s4654_s3 + $0x70] sm:$0x3f] }
 0x107   : > { %v851_v0 = vmax.f32 %v838_v62, 0.0  ;;  %v578_v2 = vmax.f32 %v3861_v1, %v559_v63  ;;  %v684_v1 = vpop.f32.mrf.mxu2  ;;  %v4090_v62 = vld [vmem:[#allocation2 + $0x36] sm:$0xff] }
 0x108   : > { %v4014_v42 = vld [vmem:[#allocation2 + $0x3a] sm:$0xff] }
 0x109   : > { %865 = vst.msk [vmem:[#allocation2 + $0x48] sm:$0xff] %vm855_vm3, %v851_v0  ;;  %v700_v7 = vmax.f32 %v578_v2, %v681_v58  ;;  %3386 = vmatmul.msk.f32.vlgmr.msra.gmra.mxu0 %vm855_vm3, %v1168_v6  ;;  %v3483_v63 = vld [vmem:[%s4654_s3 + $0x78] sm:$0x3f]  ;;  %v4105_v6 = vld [vmem:[#allocation2 + $0x3e] sm:$0xff] }
 0x10a   : > { %3378 = vmatmul.msk.f32.gmra.mxu3 %vm855_vm3, %v3965_v3  ;;  %3370 = vmatmul.msk.f32.gmra.mxu2 %vm855_vm3, %v1247_v46  ;;  %v4035_v46 = vld [vmem:[#allocation2 + $0x33] sm:$0xff] }
 0x10b   : > { %3398 = vmatmul.msk.f32.gmra.mxu1 %vm855_vm3, %v3971_v9  ;;  %v822_v10 = vmax.f32 %v700_v7, %v803_v61  ;;  %v1482_v61 = vld [vmem:[#allocation2 + $0x1d] sm:$0xff] }
 0x10c   : > { %v3492_v7 = vld [vmem:[%s4654_s3 + $0x80] sm:$0x3f] }
 0x10d   : > { %v839_v11 = vadd.f32 %v3874_v17, %v822_v10 }
 0x10e   : > { %v562_v12 = vpop.f32.mrf.mxu1 }
 0x10f   : > { %v852_v14 = vmax.f32 %v839_v11, 0.0  ;;  %v579_v15 = vmax.f32 %v3863_v4, %v562_v12  ;;  %v3438_v4 = vld [vmem:[%s4654_s3 + $0x50] sm:$0x3f]  ;;  %v687_v25 = vpop.f32.mrf.mxu2  ;;  %v4119_v12 = vld [vmem:[#allocation2 + $0x3b] sm:$0xff] }
 0x110   : > { %3439 = vmatpush.msk.msra.mxu2 %vm908_vm2, %v3438_v4  ;;  %v1484_v11 = vld [vmem:[#allocation2 + $0x2d] sm:$0xff] }
 0x111   : > { %866 = vst.msk [vmem:[#allocation2 + $0x50] sm:$0xff] %vm855_vm3, %v852_v14  ;;  %v701_v20 = vmax.f32 %v579_v15, %v684_v1  ;;  %3387 = vmatmul.msk.f32.gmra.mxu0 %vm855_vm3, %v1169_v19 }
 0x112   : > { %3379 = vmatmul.msk.f32.gmra.mxu3 %vm855_vm3, %v1092_v16  ;;  %3371 = vmatmul.msk.f32.gmra.mxu2 %vm855_vm3, %v1248_v56  ;;  %v1481_v56 = vld [vmem:[#allocation2 + $0x15] sm:$0xff] }
 0x113   : > { %3399 = vmatmul.msk.f32.gmra.mxu1 %vm855_vm3, %v3981_v21  ;;  %v823_v22 = vmax.f32 %v701_v20, %v806_v13  ;;  %v1870_v13 = vld [vmem:[#allocation2 + $0x17] sm:$0xff]  ;;  %v4136_v20 = vld [vmem:[#allocation2 + $0x1f] sm:$0xff] }
 0x115   : > { %v840_v23 = vadd.f32 %v3874_v17, %v823_v22 }
 0x116   : > { %v565_v24 = vpop.f32.mrf.mxu1 }
 0x117   : > { %v853_v26 = vmax.f32 %v840_v23, 0.0  ;;  %v580_v27 = vmax.f32 %v3865_v8, %v565_v24  ;;  %v3447_v8 = vld [vmem:[%s4654_s3 + $0x58] sm:$0x3f]  ;;  %v4149_v24 = vld [vmem:[#allocation2 + $0x27] sm:$0xff] }
 0x118   : > { %3448 = vmatpush.msk.msra.mxu3 %vm908_vm2, %v3447_v8  ;;  %v4144_v23 = vld [vmem:[#allocation2 + $0x3d] sm:$0xff] }
 0x119   : > { %867 = vst.msk [vmem:[#allocation2 + $0x58] sm:$0xff] %vm855_vm3, %v853_v26  ;;  %v702_v33 = vmax.f32 %v580_v27, %v687_v25  ;;  %3388 = vmatmul.msk.f32.gmra.mxu0 %vm855_vm3, %v3992_v31 }
 0x11a   : > { %3380 = vmatmul.msk.f32.gmra.mxu3 %vm855_vm3, %v1093_v28  ;;  %3372 = vmatmul.msk.f32.gmra.mxu2 %vm855_vm3, %v3971_v9 }
 0x11b   : > { %3400 = vmatmul.msk.f32.gmra.mxu1 %vm855_vm3, %v3998_v34  ;;  %v824_v35 = vmax.f32 %v702_v33, %v809_v32 }
 0x11d   : > { %v841_v36 = vadd.f32 %v3874_v17, %v824_v35  ;;  %v3456_v17 = vld [vmem:[%s4654_s3 + $0x60] sm:$0x3f] }
 0x11e   : > { %3457 = vmatpush.msk.msra.mxu0 %vm908_vm2, %v3456_v17 }
 0x11f   : > { %v854_v37 = vmax.f32 %v841_v36, 0.0 }
 0x121   : > { %869 = vst.msk [vmem:[#allocation2 + $0x60] sm:$0xf] %vm868_vm4, %v854_v37  ;;  %3389 = vmatmul.msk.f32.gmra.mxu0 %vm855_vm3, %v4009_v39 }
 0x122   : > { %3381 = vmatmul.msk.f32.gmra.mxu3 %vm855_vm3, %v1094_v38  ;;  %3373 = vmatmul.msk.f32.gmra.mxu2 %vm855_vm3, %v3981_v21 }
 0x123   : > { %3401 = vmatmul.msk.f32.gmra.mxu1 %vm855_vm3, %v4014_v42 }
 0x129   : > { %3390 = vmatmul.msk.f32.gmra.mxu0 %vm855_vm3, %v4026_v44 }
 0x12a   : > { %3382 = vmatmul.msk.f32.gmra.mxu3 %vm855_vm3, %v4024_v43  ;;  %3374 = vmatmul.msk.f32.gmra.mxu2 %vm855_vm3, %v3998_v34 }
 0x12b   : > { %3431 = vmatmul.msk.f32.vlgmr.msra.gmra.mxu1 %vm855_vm3, %v1558_v45 }
 0x131   : > { %3391 = vmatmul.msk.f32.gmra.mxu0 %vm855_vm3, %v4037_v47 }
 0x132   : > { %3383 = vmatmul.msk.f32.gmra.mxu3 %vm855_vm3, %v4035_v46  ;;  %3404 = vmatmul.msk.f32.vlgmr.msrb.gmra.mxu2 %vm855_vm3, %v3965_v3  ;;  %v1483_v3 = vld [vmem:[#allocation2 + $0x25] sm:$0xff] }
 0x133   : > { %3432 = vmatmul.msk.f32.gmra.mxu1 %vm855_vm3, %v4043_v48  ;;  %3475 = vmatpush.msk.msrb.mxu2 %vm908_vm2, %v3474_v60  ;;  %v3519_v60 = vld [vmem:[%s4654_s3 + $0x98] sm:$0x3f] }
 0x139   : > { %3392 = vmatmul.msk.f32.gmra.mxu0 %vm855_vm3, %v4049_v49 }
 0x13a   : > { %3413 = vmatmul.msk.f32.vlgmr.msrb.gmra.mxu3 %vm855_vm3, %v1169_v19  ;;  %3405 = vmatmul.msk.f32.gmra.mxu2 %vm855_vm3, %v1092_v16  ;;  %v4131_v16 = vld [vmem:[#allocation2 + $0x3c] sm:$0xff] }
 0x13b   : > { %3433 = vmatmul.msk.f32.gmra.mxu1 %vm855_vm3, %v4054_v50  ;;  %3484 = vmatpush.msk.msrb.mxu3 %vm908_vm2, %v3483_v63  ;;  %v1485_v19 = vld [vmem:[#allocation2 + $0x35] sm:$0xff] }
 0x141   : > { %3422 = vmatmul.msk.f32.vlgmr.msrb.gmra.mxu0 %vm855_vm3, %v1480_v52 }
 0x142   : > { %3414 = vmatmul.msk.f32.gmra.mxu3 %vm855_vm3, %v3992_v31  ;;  %3406 = vmatmul.msk.f32.gmra.mxu2 %vm855_vm3, %v1093_v28  ;;  %v3501_v28 = vld [vmem:[%s4654_s3 + $0x88] sm:$0x3f] }
 0x143   : > { %3434 = vmatmul.msk.f32.gmra.mxu1 %vm855_vm3, %v4066_v53  ;;  %3493 = vmatpush.msk.msrb.mxu0 %vm908_vm2, %v3492_v7 }
 0x144   : > { %3502 = vmatpush.msk.msra.mxu1 %vm908_vm2, %v3501_v28  ;;  %v4211_v28 = vld [vmem:[#allocation2 + $0x47] sm:$0xff] }
 0x146   : > { %v4071_v55 = vpop.f32.mrf.mxu1 }
 0x149   : > { %3423 = vmatmul.msk.f32.gmra.mxu0 %vm855_vm3, %v1481_v56 }
 0x14a   : > { %3415 = vmatmul.msk.f32.gmra.mxu3 %vm855_vm3, %v4009_v39  ;;  %3407 = vmatmul.msk.f32.gmra.mxu2 %vm855_vm3, %v1094_v38  ;;  %v4180_v38 = vld [vmem:[#allocation2 + $0x37] sm:$0xff] }
 0x14b   : > { %3435 = vmatmul.msk.f32.gmra.mxu1 %vm855_vm3, %v4076_v57 }
 0x14e   : > { %v929_v58 = vpop.f32.mrf.mxu0 }
 0x14f   : > { %v4081_v59 = vpop.f32.mrf.mxu1  ;;  %v992_v32 = vadd.f32 %v4071_v55, %v929_v58  ;;  %v4194_v58 = vld [vmem:[#allocation2 + $0x3f] sm:$0xff] }
 0x151   : > { %3424 = vmatmul.msk.f32.gmra.mxu0 %vm855_vm3, %v1482_v61 }
 0x152   : > { %3416 = vmatmul.msk.f32.gmra.mxu3 %vm855_vm3, %v4026_v44  ;;  %3408 = vmatmul.msk.f32.gmra.mxu2 %vm855_vm3, %v4024_v43 }
 0x153   : > { %3436 = vmatmul.msk.f32.gmra.mxu1 %vm855_vm3, %v4090_v62 }
 0x156   : > { %v932_v0 = vpop.f32.mrf.mxu0 }
 0x157   : > { %v4100_v2 = vpop.f32.mrf.mxu1 }
 0x159   : > { %3425 = vmatmul.msk.f32.gmra.mxu0 %vm855_vm3, %v1483_v3 }
 0x15a   : > { %3417 = vmatmul.msk.f32.gmra.mxu3 %vm855_vm3, %v4037_v47  ;;  %3409 = vmatmul.msk.f32.gmra.mxu2 %vm855_vm3, %v4035_v46 }
 0x15b   : > { %3437 = vmatmul.msk.f32.gmra.mxu1 %vm855_vm3, %v4105_v6 }
 0x15e   : > { %v4115_v10 = vpop.f32.mrf.mxu0 }
 0x15f   : > { %v4117_v1 = vpop.f32.mrf.mxu1 }
 0x161   : > { %3426 = vmatmul.msk.f32.gmra.mxu0 %vm855_vm3, %v1484_v11 }
 0x162   : > { %3418 = vmatmul.msk.f32.gmra.mxu3 %vm855_vm3, %v4049_v49  ;;  %3410 = vmatmul.msk.f32.gmra.mxu2 %vm855_vm3, %v4119_v12 }
 0x163   : > { %3467 = vmatmul.msk.f32.vlgmr.msrb.gmra.mxu1 %vm855_vm3, %v1870_v13 }
 0x166   : > { %v4127_v14 = vpop.f32.mrf.mxu0 }
 0x167   : > { %v4129_v15 = vpop.f32.mrf.mxu1 }
 0x169   : > { %3427 = vmatmul.msk.f32.gmra.mxu0 %vm855_vm3, %v1485_v19 }
 0x16a   : > { %3419 = vmatmul.msk.f32.gmra.mxu3 %vm855_vm3, %v4131_v16  ;;  %3440 = vmatmul.msk.f32.vlgmr.msra.gmra.mxu2 %vm855_vm3, %v3992_v31  ;;  %v4166_v31 = vld [vmem:[#allocation2 + $0x2f] sm:$0xff] }
 0x16b   : > { %3468 = vmatmul.msk.f32.gmra.mxu1 %vm855_vm3, %v4136_v20 }
 0x16e   : > { %v4142_v4 = vpop.f32.mrf.mxu0 }
 0x16f   : > { %v1296_v22 = vpop.f32.mrf.mxu1 }
 0x171   : > { %3428 = vmatmul.msk.f32.gmra.mxu0 %vm855_vm3, %v4144_v23 }
 0x172   : > { %3449 = vmatmul.msk.f32.vlgmr.msra.gmra.mxu3 %vm855_vm3, %v1481_v56  ;;  %3441 = vmatmul.msk.f32.gmra.mxu2 %vm855_vm3, %v4009_v39  ;;  %v995_v39 = vadd.f32 %v4081_v59, %v932_v0  ;;  %v3510_v56 = vld [vmem:[%s4654_s3 + $0x90] sm:$0x3f] }
 0x173   : > { %3469 = vmatmul.msk.f32.gmra.mxu1 %vm855_vm3, %v4149_v24  ;;  %3511 = vmatpush.msk.msra.mxu2 %vm908_vm2, %v3510_v56 }
 0x174   : > { %3520 = vmatpush.msk.msra.mxu3 %vm908_vm2, %v3519_v60 }
 0x175   : > { %v4155_v25 = vpop.f32.mrf.mxu2 }
 0x176   : > { %v4157_v26 = vpop.f32.mrf.mxu0 }
 0x178   : > { %v1299_v27 = vpop.f32.mrf.mxu1 }
 0x179   : > { %3458 = vmatmul.msk.f32.vlgmr.msra.gmra.mxu0 %vm855_vm3, %v4043_v48 }
 0x17a   : > { %3450 = vmatmul.msk.f32.gmra.mxu3 %vm855_vm3, %v1482_v61  ;;  %3442 = vmatmul.msk.f32.gmra.mxu2 %vm855_vm3, %v4026_v44  ;;  %v998_v61 = vadd.f32 %v4100_v2, %v4115_v10  ;;  %v3528_v2 = vld [vmem:[%s4654_s3 + $0xa0] sm:$0x3f]  ;;  %v1001_v10 = vadd.f32 %v4117_v1, %v4127_v14  ;;  %v1004_v1 = vadd.f32 %v4129_v15, %v4142_v4 }
 0x17b   : > { %3470 = vmatmul.msk.f32.gmra.mxu1 %vm855_vm3, %v4166_v31  ;;  %3529 = vmatpush.msk.msra.mxu0 %vm908_vm2, %v3528_v2  ;;  %v1007_v15 = vadd.f32 %v4155_v25, %v4157_v26 }
 0x17d   : > { %v4173_v33 = vpop.f32.mrf.mxu3  ;;  %v1062_v8 = vpop.f32.mrf.mxu2 }
 0x17e   : > { %v1083_v35 = vadd.f32 %v1062_v8, %v992_v32  ;;  %v4175_v36 = vpop.f32.mrf.mxu0 }
 0x17f   : > { %v1010_v25 = vadd.f32 %v4173_v33, %v4175_v36 }
 0x180   : > { %v1302_v37 = vpop.f32.mrf.mxu1 }
 0x181   : > { %3459 = vmatmul.msk.f32.gmra.mxu0 %vm855_vm3, %v4054_v50 }
 0x182   : > { %3451 = vmatmul.msk.f32.gmra.mxu3 %vm855_vm3, %v1483_v3  ;;  %3443 = vmatmul.msk.f32.gmra.mxu2 %vm855_vm3, %v4037_v47 }
 0x183   : > { %3471 = vmatmul.msk.f32.gmra.mxu1 %vm855_vm3, %v4180_v38 }
 0x185   : > { %v1140_v17 = vpop.f32.mrf.mxu3  ;;  %v1065_v44 = vpop.f32.mrf.mxu2 }
 0x186   : > { %v1161_v45 = vadd.f32 %v1140_v17, %v1083_v35  ;;  %v1084_v48 = vadd.f32 %v1065_v44, %v995_v39  ;;  %v1218_v51 = vpop.f32.mrf.mxu0 }
 0x188   : > { %v1239_v52 = vadd.f32 %v1218_v51, %v1161_v45  ;;  %v1305_v55 = vpop.f32.mrf.mxu1  ;;  %v4225_v45 = vld [vmem:[#allocation2 + $0x44] sm:$0xff] }
 0x189   : > { %3460 = vmatmul.msk.f32.gmra.mxu0 %vm855_vm3, %v4066_v53 }
 0x18a   : > { %3452 = vmatmul.msk.f32.gmra.mxu3 %vm855_vm3, %v1484_v11  ;;  %v4196_v59 = vadd.f32 %v1296_v22, %v1239_v52  ;;  %3444 = vmatmul.msk.f32.gmra.mxu2 %vm855_vm3, %v4049_v49 }
 0x18b   : > { %3472 = vmatmul.msk.f32.gmra.mxu1 %vm855_vm3, %v4194_v58 }
 0x18d   : > { %v1143_v63 = vpop.f32.mrf.mxu3  ;;  %v1068_v0 = vpop.f32.mrf.mxu2 }
 0x18e   : > { %v1162_v3 = vadd.f32 %v1143_v63, %v1084_v48  ;;  %v1085_v7 = vadd.f32 %v1068_v0, %v998_v61  ;;  %v1221_v11 = vpop.f32.mrf.mxu0  ;;  %v1720_v63 = vld [vmem:[#allocation2 + $0x45] sm:$0xff] }
 0x190   : > { %v1240_v13 = vadd.f32 %v1221_v11, %v1162_v3  ;;  %v1308_v22 = vpop.f32.mrf.mxu1 }
 0x191   : > { %3461 = vmatmul.msk.f32.gmra.mxu0 %vm855_vm3, %v4076_v57 }
 0x192   : > { %3453 = vmatmul.msk.f32.gmra.mxu3 %vm855_vm3, %v1485_v19  ;;  %v4213_v32 = vadd.f32 %v1299_v27, %v1240_v13  ;;  %3445 = vmatmul.msk.f32.gmra.mxu2 %vm855_vm3, %v4131_v16 }
 0x193   : > { %3473 = vmatmul.msk.f32.gmra.mxu1 %vm855_vm3, %v4211_v28 }
 0x195   : > { %v1146_v19 = vpop.f32.mrf.mxu3  ;;  %v1071_v8 = vpop.f32.mrf.mxu2 }
 0x196   : > { %v1163_v35 = vadd.f32 %v1146_v19, %v1085_v7  ;;  %v1086_v27 = vadd.f32 %v1071_v8, %v1001_v10  ;;  %v1224_v39 = vpop.f32.mrf.mxu0  ;;  %v4250_v10 = vld [vmem:[#allocation2 + $0x46] sm:$0xff] }
 0x198   : > { %v1241_v17 = vadd.f32 %v1224_v39, %v1163_v35  ;;  %v1311_v44 = vpop.f32.mrf.mxu1 }
 0x199   : > { %3462 = vmatmul.msk.f32.gmra.mxu0 %vm855_vm3, %v4090_v62 }
 0x19a   : > { %3454 = vmatmul.msk.f32.gmra.mxu3 %vm855_vm3, %v4144_v23  ;;  %v4231_v48 = vadd.f32 %v1302_v37, %v1241_v17  ;;  %3446 = vmatmul.msk.f32.gmra.mxu2 %vm855_vm3, %v4225_v45 }
 0x19b   : > { %3503 = vmatmul.msk.f32.vlgmr.msra.gmra.mxu1 %vm855_vm3, %v3909_v18 }
 0x19d   : > { %v1149_v14 = vpop.f32.mrf.mxu3  ;;  %v1074_v51 = vpop.f32.mrf.mxu2 }
 0x19e   : > { %v1164_v52 = vadd.f32 %v1149_v14, %v1086_v27  ;;  %v1087_v56 = vadd.f32 %v1074_v51, %v1004_v1  ;;  %v1227_v60 = vpop.f32.mrf.mxu0 }
 0x1a0   : > { %v1242_v23 = vadd.f32 %v1227_v60, %v1164_v52  ;;  %v1314_v61 = vpop.f32.mrf.mxu1 }
 0x1a1   : > { %3463 = vmatmul.msk.f32.gmra.mxu0 %vm855_vm3, %v4105_v6 }
 0x1a2   : > { %3455 = vmatmul.msk.f32.gmra.mxu3 %vm855_vm3, %v1720_v63  ;;  %v4242_v37 = vadd.f32 %v1305_v55, %v1242_v23  ;;  %3476 = vmatmul.msk.f32.vlgmr.msrb.gmra.mxu2 %vm855_vm3, %v3902_v5 }
 0x1a3   : > { %3504 = vmatmul.msk.f32.gmra.mxu1 %vm855_vm3, %v3925_v30 }
 0x1a5   : > { %v1152_v4 = vpop.f32.mrf.mxu3  ;;  %v1077_v0 = vpop.f32.mrf.mxu2 }
 0x1a6   : > { %v1165_v3 = vadd.f32 %v1152_v4, %v1087_v56  ;;  %v1088_v7 = vadd.f32 %v1077_v0, %v1007_v15  ;;  %v1230_v11 = vpop.f32.mrf.mxu0 }
 0x1a8   : > { %v1243_v13 = vadd.f32 %v1230_v11, %v1165_v3  ;;  %v1608_v2 = vpop.f32.mrf.mxu1  ;;  %v4319_v11 = vld [vmem:[#allocation2 + $0x50] sm:$0xff] }
 0x1a9   : > { %3464 = vmatmul.msk.f32.gmra.mxu0 %vm855_vm3, %v4250_v10 }
 0x1aa   : > { %3485 = vmatmul.msk.f32.vlgmr.msrb.gmra.mxu3 %vm855_vm3, %v4054_v50  ;;  %v4256_v5 = vadd.f32 %v1308_v22, %v1243_v13  ;;  %3477 = vmatmul.msk.f32.gmra.mxu2 %vm855_vm3, %v3909_v18  ;;  %v3537_v50 = vld [vmem:[%s4654_s3 + $0xa8] sm:$0x3f]  ;;  %v4272_v18 = vld [vmem:[#allocation2 + $0x38] sm:$0xff] }
 0x1ab   : > { %3505 = vmatmul.msk.f32.gmra.mxu1 %vm855_vm3, %v3937_v41 }
 0x1ac   : > { %3538 = vmatpush.msk.msrb.mxu1 %vm908_vm2, %v3537_v50 }
 0x1ad   : > { %v1155_v26 = vpop.f32.mrf.mxu3  ;;  %v1080_v55 = vpop.f32.mrf.mxu2 }
 0x1ae   : > { %v1166_v19 = vadd.f32 %v1155_v26, %v1088_v7  ;;  %v1089_v8 = vadd.f32 %v1080_v55, %v1010_v25  ;;  %v1233_v35 = vpop.f32.mrf.mxu0 }
 0x1b0   : > { %v1244_v27 = vadd.f32 %v1233_v35, %v1166_v19  ;;  %v1611_v22 = vpop.f32.mrf.mxu1 }
 0x1b1   : > { %3494 = vmatmul.msk.f32.vlgmr.msrb.gmra.mxu0 %vm855_vm3, %v4136_v20  ;;  %v4285_v20 = vld [vmem:[#allocation2 + $0x40] sm:$0xff] }
 0x1b2   : > { %3486 = vmatmul.msk.f32.gmra.mxu3 %vm855_vm3, %v4066_v53  ;;  %v4274_v33 = vadd.f32 %v1311_v44, %v1244_v27  ;;  %3478 = vmatmul.msk.f32.gmra.mxu2 %vm855_vm3, %v3925_v30 }
 0x1b3   : > { %3506 = vmatmul.msk.f32.gmra.mxu1 %vm855_vm3, %v4272_v18 }
 0x1b5   : > { %v1158_v36 = vpop.f32.mrf.mxu3  ;;  %v1374_v17 = vpop.f32.mrf.mxu2 }
 0x1b6   : > { %v1167_v39 = vadd.f32 %v1158_v36, %v1089_v8  ;;  %v1395_v1 = vadd.f32 %v1374_v17, %v4196_v59  ;;  %v1236_v14 = vpop.f32.mrf.mxu0 }
 0x1b8   : > { %v1245_v53 = vadd.f32 %v1236_v14, %v1167_v39  ;;  %v1614_v51 = vpop.f32.mrf.mxu1 }
 0x1b9   : > { %3495 = vmatmul.msk.f32.gmra.mxu0 %vm855_vm3, %v4149_v24  ;;  %v3546_v24 = vld [vmem:[%s4654_s3 + $0xb0] sm:$0x3f] }
 0x1ba   : > { %3487 = vmatmul.msk.f32.gmra.mxu3 %vm855_vm3, %v4076_v57  ;;  %v4287_v44 = vadd.f32 %v1314_v61, %v1245_v53  ;;  %3479 = vmatmul.msk.f32.gmra.mxu2 %vm855_vm3, %v3937_v41  ;;  %v4302_v61 = vld [vmem:[#allocation2 + $0x48] sm:$0xff] }
 0x1bb   : > { %3507 = vmatmul.msk.f32.gmra.mxu1 %vm855_vm3, %v4285_v20  ;;  %3547 = vmatpush.msk.msrb.mxu2 %vm908_vm2, %v3546_v24 }
 0x1bd   : > { %v1452_v59 = vpop.f32.mrf.mxu3  ;;  %v1377_v52 = vpop.f32.mrf.mxu2 }
 0x1be   : > { %v1473_v56 = vadd.f32 %v1452_v59, %v1395_v1  ;;  %v1396_v60 = vadd.f32 %v1377_v52, %v4213_v32  ;;  %v1530_v57 = vpop.f32.mrf.mxu0  ;;  %v3555_v32 = vld [vmem:[%s4654_s3 + $0xb8] sm:$0x3f] }
 0x1bf   : > { %3556 = vmatpush.msk.msrb.mxu3 %vm908_vm2, %v3555_v32 }
 0x1c0   : > { %v1551_v23 = vadd.f32 %v1530_v57, %v1473_v56 }
 0x1c1   : > { %3496 = vmatmul.msk.f32.gmra.mxu0 %vm855_vm3, %v4166_v31 }
 0x1c2   : > { %3488 = vmatmul.msk.f32.gmra.mxu3 %vm855_vm3, %v4090_v62  ;;  %v4304_v63 = vadd.f32 %v1608_v2, %v1551_v23  ;;  %3480 = vmatmul.msk.f32.gmra.mxu2 %vm855_vm3, %v4272_v18  ;;  %v1617_v62 = vpop.f32.mrf.mxu1 }
 0x1c3   : > { %3508 = vmatmul.msk.f32.gmra.mxu1 %vm855_vm3, %v4302_v61 }
 0x1c5   : > { %v1455_v15 = vpop.f32.mrf.mxu3  ;;  %v1380_v4 = vpop.f32.mrf.mxu2 }
 0x1c6   : > { %v1474_v31 = vadd.f32 %v1455_v15, %v1396_v60  ;;  %v1397_v0 = vadd.f32 %v1380_v4, %v4231_v48  ;;  %v1533_v3 = vpop.f32.mrf.mxu0  ;;  %v3564_v48 = vld [vmem:[%s4654_s3 + $0xc0] sm:$0x3f] }
 0x1c7   : > { %3565 = vmatpush.msk.msrb.mxu0 %vm908_vm2, %v3564_v48 }
 0x1c8   : > { %v1552_v7 = vadd.f32 %v1533_v3, %v1474_v31 }
 0x1c9   : > { %3497 = vmatmul.msk.f32.gmra.mxu0 %vm855_vm3, %v4180_v38 }
 0x1ca   : > { %3489 = vmatmul.msk.f32.gmra.mxu3 %vm855_vm3, %v4105_v6  ;;  %v4321_v13 = vadd.f32 %v1611_v22, %v1552_v7  ;;  %3481 = vmatmul.msk.f32.gmra.mxu2 %vm855_vm3, %v4285_v20  ;;  %v4331_v38 = vpop.f32.mrf.mxu1 }
 0x1cb   : > { %3509 = vmatmul.msk.f32.gmra.mxu1 %vm855_vm3, %v4319_v11 }
 0x1cd   : > { %v1458_v6 = vpop.f32.mrf.mxu3  ;;  %v1383_v2 = vpop.f32.mrf.mxu2 }
 0x1ce   : > { %v1475_v25 = vadd.f32 %v1458_v6, %v1397_v0  ;;  %v1398_v26 = vadd.f32 %v1383_v2, %v4242_v37  ;;  %v1536_v55 = vpop.f32.mrf.mxu0 }
 0x1d0   : > { %v1553_v19 = vadd.f32 %v1536_v55, %v1475_v25  ;;  %v4402_v55 = vld [vmem:[#allocation2 + $0x42] sm:$0xff] }
 0x1d1   : > { %3498 = vmatmul.msk.f32.gmra.mxu0 %vm855_vm3, %v4194_v58 }
 0x1d2   : > { %3490 = vmatmul.msk.f32.gmra.mxu3 %vm855_vm3, %v4250_v10  ;;  %v4338_v8 = vadd.f32 %v1614_v51, %v1553_v19  ;;  %3482 = vmatmul.msk.f32.gmra.mxu2 %vm855_vm3, %v4302_v61  ;;  %v4345_v39 = vpop.f32.mrf.mxu1  ;;  %v2032_v10 = vld [vmem:[#allocation2 + $0x4e] sm:$0xff] }
 0x1d3   : > { %3539 = vmatmul.msk.f32.vlgmr.msrb.gmra.mxu1 %vm855_vm3, %v3935_v40  ;;  %v2110_v51 = vld [vmem:[#allocation2 + $0x4f] sm:$0xff] }
 0x1d5   : > { %v1461_v35 = vpop.f32.mrf.mxu3  ;;  %v1386_v27 = vpop.f32.mrf.mxu2 }
 0x1d6   : > { %v1476_v50 = vadd.f32 %v1461_v35, %v1398_v26  ;;  %v1399_v37 = vadd.f32 %v1386_v27, %v4256_v5  ;;  %v1539_v22 = vpop.f32.mrf.mxu0 }
 0x1d8   : > { %v1554_v36 = vadd.f32 %v1539_v22, %v1476_v50 }
 0x1d9   : > { %3499 = vmatmul.msk.f32.gmra.mxu0 %vm855_vm3, %v4211_v28  ;;  %v2496_v28 = vld [vmem:[#allocation2 + $0x39] sm:$0xff] }
 0x1da   : > { %3491 = vmatmul.msk.f32.gmra.mxu3 %vm855_vm3, %v2032_v10  ;;  %v4350_v58 = vadd.f32 %v1617_v62, %v1554_v36  ;;  %3512 = vmatmul.msk.f32.vlgmr.msra.gmra.mxu2 %vm855_vm3, %v3923_v29  ;;  %v4364_v59 = vpop.f32.mrf.mxu1  ;;  %v4413_v36 = vld [vmem:[#allocation2 + $0x4a] sm:$0xff] }
 0x1db   : > { %3540 = vmatmul.msk.f32.gmra.mxu1 %vm855_vm3, %v3951_v54 }
 0x1dd   : > { %v1464_v17 = vpop.f32.mrf.mxu3  ;;  %v1389_v5 = vpop.f32.mrf.mxu2 }
 0x1de   : > { %v4356_v1 = vadd.f32 %v1464_v17, %v1399_v37  ;;  %v1400_v14 = vadd.f32 %v1389_v5, %v4274_v33  ;;  %v4359_v53 = vpop.f32.mrf.mxu0 }
 0x1e0   : > { %v1555_v5 = vadd.f32 %v4359_v53, %v4356_v1 }
 0x1e1   : > { %3500 = vmatmul.msk.f32.gmra.mxu0 %vm855_vm3, %v2110_v51 }
 0x1e2   : > { %3521 = vmatmul.msk.f32.vlgmr.msra.gmra.mxu3 %vm855_vm3, %v3971_v9  ;;  %3513 = vmatmul.msk.f32.gmra.mxu2 %vm855_vm3, %v3935_v40  ;;  %v2497_v9 = vld [vmem:[#allocation2 + $0x41] sm:$0xff]  ;;  %v1920_v40 = vpop.f32.mrf.mxu1 }
 0x1e3   : > { %3541 = vmatmul.msk.f32.gmra.mxu1 %vm855_vm3, %v2496_v28 }
 0x1e5   : > { %v1467_v29 = vpop.f32.mrf.mxu3  ;;  %v1392_v52 = vpop.f32.mrf.mxu2 }
 0x1e6   : > { %v4369_v56 = vadd.f32 %v1467_v29, %v1400_v14  ;;  %v1401_v33 = vadd.f32 %v1392_v52, %v4287_v44  ;;  %v4372_v60 = vpop.f32.mrf.mxu0  ;;  %v4424_v29 = vld [vmem:[#allocation2 + $0x52] sm:$0xff]  ;;  %v1633_v52 = vadd.f32 %v4331_v38, %v1555_v5 }
 0x1e9   : > { %3530 = vmatmul.msk.f32.vlgmr.msra.gmra.mxu0 %vm855_vm3, %v3925_v30  ;;  %v2498_v30 = vld [vmem:[#allocation2 + $0x49] sm:$0xff] }
 0x1ea   : > { %3522 = vmatmul.msk.f32.gmra.mxu3 %vm855_vm3, %v3981_v21  ;;  %3514 = vmatmul.msk.f32.gmra.mxu2 %vm855_vm3, %v3951_v54  ;;  %v1923_v4 = vpop.f32.mrf.mxu1 }
 0x1eb   : > { %3542 = vmatmul.msk.f32.gmra.mxu1 %vm855_vm3, %v2497_v9 }
 0x1ed   : > { %v1470_v57 = vpop.f32.mrf.mxu3  ;;  %v1686_v24 = vpop.f32.mrf.mxu2 }
 0x1ee   : > { %v4381_v23 = vadd.f32 %v1470_v57, %v1401_v33  ;;  %v1707_v44 = vadd.f32 %v1686_v24, %v4304_v63  ;;  %v4384_v32 = vpop.f32.mrf.mxu0 }
 0x1f1   : > { %3531 = vmatmul.msk.f32.gmra.mxu0 %vm855_vm3, %v3937_v41  ;;  %v2499_v41 = vld [vmem:[#allocation2 + $0x51] sm:$0xff] }
 0x1f2   : > { %3523 = vmatmul.msk.f32.gmra.mxu3 %vm855_vm3, %v3998_v34  ;;  %3515 = vmatmul.msk.f32.gmra.mxu2 %vm855_vm3, %v2496_v28  ;;  %v1926_v26 = vpop.f32.mrf.mxu1 }
 0x1f3   : > { %3543 = vmatmul.msk.f32.gmra.mxu1 %vm855_vm3, %v2498_v30 }
 0x1f5   : > { %v1764_v54 = vpop.f32.mrf.mxu3  ;;  %v1689_v62 = vpop.f32.mrf.mxu2 }
 0x1f6   : > { %v1785_v15 = vadd.f32 %v1764_v54, %v1707_v44  ;;  %v1708_v31 = vadd.f32 %v1689_v62, %v4321_v13  ;;  %v1842_v63 = vpop.f32.mrf.mxu0  ;;  %v2422_v44 = vld [vmem:[#allocation2 + $0x58] sm:$0xff] }
 0x1f8   : > { %v1863_v0 = vadd.f32 %v1842_v63, %v1785_v15 }
 0x1f9   : > { %3532 = vmatmul.msk.f32.gmra.mxu0 %vm855_vm3, %v4272_v18  ;;  %v2500_v18 = vld [vmem:[#allocation2 + $0x59] sm:$0xff] }
 0x1fa   : > { %3524 = vmatmul.msk.f32.gmra.mxu3 %vm855_vm3, %v4014_v42  ;;  %v4397_v3 = vadd.f32 %v1920_v40, %v1863_v0  ;;  %3516 = vmatmul.msk.f32.gmra.mxu2 %vm855_vm3, %v2497_v9  ;;  %v1929_v10 = vpop.f32.mrf.mxu1  ;;  %v1556_v9 = vadd.f32 %v4372_v60, %v4369_v56  ;;  %v1557_v56 = vadd.f32 %v4384_v32, %v4381_v23 }
 0x1fb   : > { %3544 = vmatmul.msk.f32.gmra.mxu1 %vm855_vm3, %v2499_v41 }
 0x1fd   : > { %v1767_v7 = vpop.f32.mrf.mxu3  ;;  %v1692_v48 = vpop.f32.mrf.mxu2 }
 0x1fe   : > { %v1786_v6 = vadd.f32 %v1767_v7, %v1708_v31  ;;  %v1709_v13 = vadd.f32 %v1692_v48, %v4338_v8  ;;  %v1845_v2 = vpop.f32.mrf.mxu0  ;;  %v1635_v31 = vadd.f32 %v4364_v59, %v1557_v56 }
 0x200   : > { %v1864_v25 = vadd.f32 %v1845_v2, %v1786_v6  ;;  %v2653_v2 = vld [vmem:[#allocation2 + $0x43] sm:$0xff] }
 0x201   : > { %3533 = vmatmul.msk.f32.gmra.mxu0 %vm855_vm3, %v4285_v20 }
 0x202   : > { %3525 = vmatmul.msk.f32.gmra.mxu3 %vm855_vm3, %v4402_v55  ;;  %v4408_v19 = vadd.f32 %v1923_v4, %v1864_v25  ;;  %3517 = vmatmul.msk.f32.gmra.mxu2 %vm855_vm3, %v2498_v30  ;;  %v1932_v53 = vpop.f32.mrf.mxu1  ;;  %v1634_v30 = vadd.f32 %v4345_v39, %v1556_v9 }
 0x203   : > { %3545 = vmatmul.msk.f32.gmra.mxu1 %vm855_vm3, %v2500_v18 }
 0x205   : > { %v1770_v35 = vpop.f32.mrf.mxu3  ;;  %v1695_v8 = vpop.f32.mrf.mxu2 }
 0x206   : > { %v1787_v27 = vadd.f32 %v1770_v35, %v1709_v13  ;;  %v1710_v50 = vadd.f32 %v1695_v8, %v4350_v58  ;;  %v1848_v37 = vpop.f32.mrf.mxu0 }
 0x208   : > { %v1865_v22 = vadd.f32 %v1848_v37, %v1787_v27 }
 0x209   : > { %3534 = vmatmul.msk.f32.gmra.mxu0 %vm855_vm3, %v4302_v61 }
 0x20a   : > { %3526 = vmatmul.msk.f32.gmra.mxu3 %vm855_vm3, %v4413_v36  ;;  %v4419_v20 = vadd.f32 %v1926_v26, %v1865_v22  ;;  %3518 = vmatmul.msk.f32.gmra.mxu2 %vm855_vm3, %v2499_v41  ;;  %v1935_v15 = vpop.f32.mrf.mxu1  ;;  %v2655_v22 = vld [vmem:[#allocation2 + $0x53] sm:$0xff] }
 0x20d   : > { %v1773_v17 = vpop.f32.mrf.mxu3  ;;  %v1698_v58 = vpop.f32.mrf.mxu2 }
 0x20e   : > { %v1788_v14 = vadd.f32 %v1773_v17, %v1710_v50  ;;  %v1851_v51 = vpop.f32.mrf.mxu0  ;;  %v1711_v1 = vadd.f32 %v1698_v58, %v1633_v52 }
 0x210   : > { %v1866_v28 = vadd.f32 %v1851_v51, %v1788_v14 }
 0x211   : > { %3535 = vmatmul.msk.f32.gmra.mxu0 %vm855_vm3, %v4319_v11 }
 0x212   : > { %3527 = vmatmul.msk.f32.gmra.mxu3 %vm855_vm3, %v4424_v29  ;;  %v4431_v61 = vadd.f32 %v1929_v10, %v1866_v28  ;;  %3548 = vmatmul.msk.f32.vlgmr.msrb.gmra.mxu2 %vm855_vm3, %v3981_v21  ;;  %v1938_v48 = vpop.f32.mrf.mxu1  ;;  %v2656_v28 = vld [vmem:[#allocation2 + $0x5b] sm:$0xff] }
 0x215   : > { %v1776_v33 = vpop.f32.mrf.mxu3  ;;  %v1701_v40 = vpop.f32.mrf.mxu2 }
 0x216   : > { %v1789_v57 = vadd.f32 %v1776_v33, %v1711_v1  ;;  %v1854_v38 = vpop.f32.mrf.mxu0  ;;  %v1712_v21 = vadd.f32 %v1701_v40, %v1634_v30 }
 0x218   : > { %v1867_v24 = vadd.f32 %v1854_v38, %v1789_v57  ;;  %v2734_v57 = vld [vmem:[#allocation2 + $0x5c] sm:$0xff] }
 0x219   : > { %3536 = vmatmul.msk.f32.gmra.mxu0 %vm855_vm3, %v2422_v44 }
 0x21a   : > { %3557 = vmatmul.msk.f32.vlgmr.msrb.gmra.mxu3 %vm855_vm3, %v4024_v43  ;;  %v4441_v11 = vadd.f32 %v1932_v53, %v1867_v24  ;;  %3549 = vmatmul.msk.f32.gmra.mxu2 %vm855_vm3, %v3998_v34  ;;  %v2232_v10 = vpop.f32.mrf.mxu1 }
 0x21d   : > { %v1779_v54 = vpop.f32.mrf.mxu3  ;;  %v1704_v60 = vpop.f32.mrf.mxu2 }
 0x21e   : > { %v1790_v62 = vadd.f32 %v1779_v54, %v1712_v21  ;;  %v1857_v4 = vpop.f32.mrf.mxu0  ;;  %v1713_v34 = vadd.f32 %v1704_v60, %v1635_v31 }
 0x220   : > { %v1868_v39 = vadd.f32 %v1857_v4, %v1790_v62 }
 0x221   : > { %3566 = vmatmul.msk.f32.vlgmr.msrb.gmra.mxu0 %vm855_vm3, %v4037_v47 }
 0x222   : > { %3558 = vmatmul.msk.f32.gmra.mxu3 %vm855_vm3, %v4035_v46  ;;  %v1946_v43 = vadd.f32 %v1935_v15, %v1868_v39  ;;  %3550 = vmatmul.msk.f32.gmra.mxu2 %vm855_vm3, %v4014_v42  ;;  %v2235_v9 = vpop.f32.mrf.mxu1 }
 0x225   : > { %v1782_v63 = vpop.f32.mrf.mxu3  ;;  %v1998_v32 = vpop.f32.mrf.mxu2 }
 0x226   : > { %v1791_v23 = vadd.f32 %v1782_v63, %v1713_v34  ;;  %v2019_v0 = vadd.f32 %v1998_v32, %v4397_v3  ;;  %v1860_v41 = vpop.f32.mrf.mxu0 }
 0x228   : > { %v1869_v7 = vadd.f32 %v1860_v41, %v1791_v23 }
 0x229   : > { %3567 = vmatmul.msk.f32.gmra.mxu0 %vm855_vm3, %v4049_v49 }
 0x22a   : > { %3559 = vmatmul.msk.f32.gmra.mxu3 %vm855_vm3, %v4119_v12  ;;  %v1947_v46 = vadd.f32 %v1938_v48, %v1869_v7  ;;  %3551 = vmatmul.msk.f32.gmra.mxu2 %vm855_vm3, %v4402_v55  ;;  %v2238_v54 = vpop.f32.mrf.mxu1 }
 0x22d   : > { %v2076_v42 = vpop.f32.mrf.mxu3  ;;  %v2001_v47 = vpop.f32.mrf.mxu2 }
 0x22e   : > { %v2097_v59 = vadd.f32 %v2076_v42, %v2019_v0  ;;  %v2020_v6 = vadd.f32 %v2001_v47, %v4408_v19  ;;  %v2154_v13 = vpop.f32.mrf.mxu0  ;;  %v2654_v19 = vld [vmem:[#allocation2 + $0x4b] sm:$0xff] }
 0x22f   : > { %v2825_v42 = vld [vmem:[%s4656_s5 + $0x8] sm:$0xf] }
 0x230   : > { %v4462_v3 = vadd.f32 %v2154_v13, %v2097_v59  ;;  %3577 = vmatpush.msk.msra.mxu2 %vm2841_vm5, %v2825_v42  ;;  %v3580_v13 = vld [vmem:[%s4656_s5 + $0x28] sm:$0xf] }
 0x231   : > { %3568 = vmatmul.msk.f32.gmra.mxu0 %vm855_vm3, %v4131_v16  ;;  %3581 = vmatpush.msk.msra.mxu3 %vm2841_vm5, %v3580_v13 }
 0x232   : > { %3560 = vmatmul.msk.f32.gmra.mxu3 %vm855_vm3, %v2653_v2  ;;  %3552 = vmatmul.msk.f32.gmra.mxu2 %vm855_vm3, %v4413_v36  ;;  %v2732_v36 = vld [vmem:[#allocation2 + $0x4c] sm:$0xff]  ;;  %v4495_v39 = vpop.f32.mrf.mxu1 }
 0x235   : > { %v2079_v49 = vpop.f32.mrf.mxu3  ;;  %v2004_v12 = vpop.f32.mrf.mxu2 }
 0x236   : > { %v2098_v25 = vadd.f32 %v2079_v49, %v2020_v6  ;;  %v2021_v26 = vadd.f32 %v2004_v12, %v4419_v20  ;;  %v2157_v55 = vpop.f32.mrf.mxu0  ;;  %v2578_v20 = vld [vmem:[#allocation2 + $0x5a] sm:$0xff] }
 0x237   : > { %v3574_v49 = vld [vmem:[%s4656_s5 + $0x18] sm:$0xf] }
 0x238   : > { %v4470_v18 = vadd.f32 %v2157_v55, %v2098_v25  ;;  %3575 = vmatpush.msk.msra.mxu1 %vm2841_vm5, %v3574_v49 }
 0x239   : > { %3569 = vmatmul.msk.f32.gmra.mxu0 %vm855_vm3, %v4225_v45 }
 0x23a   : > { %3561 = vmatmul.msk.f32.gmra.mxu3 %vm855_vm3, %v2654_v19  ;;  %3553 = vmatmul.msk.f32.gmra.mxu2 %vm855_vm3, %v4424_v29  ;;  %v2733_v29 = vld [vmem:[#allocation2 + $0x54] sm:$0xff]  ;;  %v4497_v23 = vpop.f32.mrf.mxu1 }
 0x23d   : > { %v2082_v16 = vpop.f32.mrf.mxu3  ;;  %v2007_v35 = vpop.f32.mrf.mxu2 }
 0x23e   : > { %v2099_v8 = vadd.f32 %v2082_v16, %v2021_v26  ;;  %v2022_v27 = vadd.f32 %v2007_v35, %v4431_v61  ;;  %v2160_v50 = vpop.f32.mrf.mxu0  ;;  %v2253_v16 = vadd.f32 %v2232_v10, %v4462_v3  ;;  %v2824_v3 = vld [vmem:[%s4656_s5] sm:$0xff] }
 0x23f   : > { %v3579_v10 = vld [vmem:[%s4656_s5 + $0x20] sm:$0xff]  ;;  %2886 = vmatpush.msra.mxu2 %v2824_v3 }
 0x240   : > { %v4478_v37 = vadd.f32 %v2160_v50, %v2099_v8  ;;  %2924 = vmatpush.msra.mxu3 %v3579_v10 }
 0x241   : > { %3570 = vmatmul.msk.f32.gmra.mxu0 %vm855_vm3, %v2732_v36 }
 0x242   : > { %3562 = vmatmul.msk.f32.gmra.mxu3 %vm855_vm3, %v2655_v22  ;;  %3554 = vmatmul.msk.f32.gmra.mxu2 %vm855_vm3, %v2578_v20  ;;  %v2254_v20 = vadd.f32 %v2235_v9, %v4470_v18 }
 0x245   : > { %v2085_v45 = vpop.f32.mrf.mxu3  ;;  %v2010_v17 = vpop.f32.mrf.mxu2 }
 0x246   : > { %v2100_v5 = vadd.f32 %v2085_v45, %v2022_v27  ;;  %v2023_v58 = vadd.f32 %v2010_v17, %v4441_v11  ;;  %v2163_v14 = vpop.f32.mrf.mxu0 }
 0x248   : > { %v4484_v51 = vadd.f32 %v2163_v14, %v2100_v5 }
 0x249   : > { %3571 = vmatmul.msk.f32.gmra.mxu0 %vm855_vm3, %v2733_v29  ;;  %v3573_v29 = vld [vmem:[%s4656_s5 + $0x10] sm:$0xff] }
 0x24a   : > { %3563 = vmatmul.msk.f32.gmra.mxu3 %vm855_vm3, %v2656_v28  ;;  %2860 = vmatpush.msra.mxu1 %v3573_v29 }
 0x24d   : > { %v2088_v52 = vpop.f32.mrf.mxu3  ;;  %v2013_v61 = vpop.f32.mrf.mxu2 }
 0x24e   : > { %v2101_v1 = vadd.f32 %v2088_v52, %v2023_v58  ;;  %v2024_v53 = vadd.f32 %v2013_v61, %v1946_v43  ;;  %v2166_v33 = vpop.f32.mrf.mxu0  ;;  %v2255_v61 = vadd.f32 %v2238_v54, %v4478_v37 }
 0x250   : > { %v4488_v40 = vadd.f32 %v2166_v33, %v2101_v1 }
 0x251   : > { %3572 = vmatmul.msk.f32.gmra.mxu0 %vm855_vm3, %v2734_v57 }
 0x255   : > { %v2091_v38 = vpop.f32.mrf.mxu3  ;;  %v2016_v24 = vpop.f32.mrf.mxu2 }
 0x256   : > { %v2102_v44 = vadd.f32 %v2091_v38, %v2024_v53  ;;  %v2025_v30 = vadd.f32 %v2016_v24, %v1947_v46  ;;  %v2169_v11 = vpop.f32.mrf.mxu0  ;;  %v4499_v46 = vpop.f32.mrf.mxu1 }
 0x258   : > { %v4491_v21 = vadd.f32 %v2169_v11, %v2102_v44 }
 0x25d   : > { %v2094_v56 = vpop.f32.mrf.mxu3  ;;  %v2310_v62 = vpop.f32.mrf.mxu2 }
 0x25e   : > { %v2103_v60 = vadd.f32 %v2094_v56, %v2025_v30  ;;  %v2172_v15 = vpop.f32.mrf.mxu0  ;;  %v4513_v2 = vpop.f32.mrf.mxu1  ;;  %v2331_v27 = vadd.f32 %v2310_v62, %v2253_v16 }
 0x260   : > { %v4493_v4 = vadd.f32 %v2172_v15, %v2103_v60  ;;  %v2256_v60 = vadd.f32 %v4495_v39, %v4484_v51  ;;  %v2257_v39 = vadd.f32 %v4497_v23, %v4488_v40 }
 0x265   : > { %v2388_v31 = vpop.f32.mrf.mxu3  ;;  %v2313_v43 = vpop.f32.mrf.mxu2 }
 0x266   : > { %v2466_v34 = vpop.f32.mrf.mxu0  ;;  %v2544_v55 = vpop.f32.mrf.mxu1  ;;  %v2409_v50 = vadd.f32 %v2388_v31, %v2331_v27  ;;  %v2332_v58 = vadd.f32 %v2313_v43, %v2254_v20 }
 0x268   : > { %v2487_v45 = vadd.f32 %v2466_v34, %v2409_v50 }
 0x26a   : > { %v2565_v28 = vadd.f32 %v2544_v55, %v2487_v45 }
 0x26d   : > { %v2391_v63 = vpop.f32.mrf.mxu3  ;;  %v2316_v32 = vpop.f32.mrf.mxu2 }
 0x26e   : > { %v2469_v0 = vpop.f32.mrf.mxu0  ;;  %v2547_v36 = vpop.f32.mrf.mxu1  ;;  %v2410_v14 = vadd.f32 %v2391_v63, %v2332_v58  ;;  %v2333_v38 = vadd.f32 %v2316_v32, %v2255_v61  ;;  %v3584_v32 = vld [vmem:[%s4656_s5 + $0x38] sm:$0xf]  ;;  %v2258_v61 = vadd.f32 %v4499_v46, %v4491_v21 }
 0x26f   : > { %3585 = vmatpush.msk.msrb.mxu1 %vm2841_vm5, %v3584_v32  ;;  %v3595_v32 = vld [vmem:[%s4656_s5 + $0x60] sm:$0xff] }
 0x270   : > { %v2488_v1 = vadd.f32 %v2469_v0, %v2410_v14  ;;  %v3592_v14 = vld [vmem:[%s4656_s5 + $0x58] sm:$0xf] }
 0x271   : > { %3593 = vmatpush.msk.msrb.mxu3 %vm2841_vm5, %v3592_v14 }
 0x272   : > { %v2566_v30 = vadd.f32 %v2547_v36, %v2488_v1 }
 0x275   : > { %v2394_v41 = vpop.f32.mrf.mxu3  ;;  %v2319_v7 = vpop.f32.mrf.mxu2 }
 0x276   : > { %v2472_v48 = vpop.f32.mrf.mxu0  ;;  %v2550_v57 = vpop.f32.mrf.mxu1  ;;  %v2411_v44 = vadd.f32 %v2394_v41, %v2333_v38  ;;  %v2334_v31 = vadd.f32 %v2319_v7, %v2256_v60  ;;  %v3583_v41 = vld [vmem:[%s4656_s5 + $0x30] sm:$0xff] }
 0x277   : > { %2963 = vmatpush.msrb.mxu1 %v3583_v41 }
 0x278   : > { %v2489_v62 = vadd.f32 %v2472_v48, %v2411_v44 }
 0x27a   : > { %v2567_v0 = vadd.f32 %v2550_v57, %v2489_v62 }
 0x27d   : > { %v2397_v47 = vpop.f32.mrf.mxu3  ;;  %v4505_v59 = vpop.f32.mrf.mxu2 }
 0x27e   : > { %v4507_v6 = vpop.f32.mrf.mxu0  ;;  %v2553_v34 = vpop.f32.mrf.mxu1  ;;  %v2412_v63 = vadd.f32 %v2397_v47, %v2334_v31  ;;  %v2335_v13 = vadd.f32 %v4505_v59, %v2257_v39  ;;  %v3588_v59 = vld [vmem:[%s4656_s5 + $0x48] sm:$0xf] }
 0x27f   : > { %3589 = vmatpush.msk.msrb.mxu2 %vm2841_vm5, %v3588_v59  ;;  %v3604_v31 = vld [vmem:[%s4656_s5 + $0x88] sm:$0xf] }
 0x280   : > { %v2490_v48 = vadd.f32 %v4507_v6, %v2412_v63 }
 0x282   : > { %v2568_v58 = vadd.f32 %v2553_v34, %v2490_v48 }
 0x285   : > { %v4519_v12 = vpop.f32.mrf.mxu3  ;;  %v4521_v25 = vpop.f32.mrf.mxu2 }
 0x286   : > { %v4523_v26 = vpop.f32.mrf.mxu0  ;;  %v2413_v36 = vadd.f32 %v4519_v12, %v2335_v13  ;;  %v3587_v12 = vld [vmem:[%s4656_s5 + $0x40] sm:$0xff]  ;;  %v2556_v3 = vpop.f32.mrf.mxu1 }
 0x287   : > { %3002 = vmatpush.msrb.mxu2 %v3587_v12 }
 0x288   : > { %v2491_v1 = vadd.f32 %v4523_v26, %v2413_v36 }
 0x28a   : > { %v2569_v60 = vadd.f32 %v2556_v3, %v2491_v1 }
 0x28d   : > { %v4525_v19 = vpop.f32.mrf.mxu3  ;;  %v4528_v35 = vpop.f32.mrf.mxu2 }
 0x28e   : > { %v4530_v8 = vpop.f32.mrf.mxu0  ;;  %v2559_v41 = vpop.f32.mrf.mxu1 }
 0x295   : > { %v4532_v22 = vpop.f32.mrf.mxu3  ;;  %v2622_v17 = vpop.f32.mrf.mxu2 }
 0x296   : > { %v4535_v5 = vpop.f32.mrf.mxu0  ;;  %v2643_v18 = vadd.f32 %v2622_v17, %v2565_v28  ;;  %v3591_v28 = vld [vmem:[%s4656_s5 + $0x50] sm:$0xff] }
 0x297   : > { %3041 = vmatpush.msrb.mxu3 %v3591_v28 }
 0x29d   : > { %v2700_v52 = vpop.f32.mrf.mxu3  ;;  %v2625_v53 = vpop.f32.mrf.mxu2 }
 0x29e   : > { %v2721_v33 = vadd.f32 %v2700_v52, %v2643_v18  ;;  %v2778_v9 = vpop.f32.mrf.mxu0  ;;  %v2644_v11 = vadd.f32 %v2625_v53, %v2566_v30  ;;  %v2336_v30 = vadd.f32 %v4521_v25, %v2258_v61  ;;  %v3600_v25 = vld [vmem:[%s4656_s5 + $0x78] sm:$0xf] }
 0x2a0   : > { %v2799_v24 = vadd.f32 %v2778_v9, %v2721_v33  ;;  %v4584_v33 = vld [vmem:[%s4655_s4] sm:$0x1]  ;;  %v2414_v62 = vadd.f32 %v4525_v19, %v2336_v30  ;;  %v3599_v19 = vld [vmem:[%s4656_s5 + $0x70] sm:$0xff] }
 0x2a2   : > { %2807 = vst.msk [vmem:[#allocation3] sm:$0xff] %vm2806_vm6, %v2799_v24  ;;  %v2492_v39 = vadd.f32 %v4530_v8, %v2414_v62 }
 0x2a5   : > { %v2703_v56 = vpop.f32.mrf.mxu3  ;;  %v2628_v15 = vpop.f32.mrf.mxu2 }
 0x2a6   : > { %v2722_v37 = vadd.f32 %v2703_v56, %v2644_v11  ;;  %v2781_v54 = vpop.f32.mrf.mxu0  ;;  %v2645_v51 = vadd.f32 %v2628_v15, %v2567_v0  ;;  %v3603_v0 = vld [vmem:[%s4656_s5 + $0x80] sm:$0xff] }
 0x2a8   : > { %v2800_v43 = vadd.f32 %v2781_v54, %v2722_v37 }
 0x2a9   : > { %v2826_v16 = vld [vmem:[#allocation3 + $0x2] sm:$0x3]  ;;  %v2815_v27 = vld [vmem:[#allocation3] sm:$0x3]  ;;  %v2891_v50 = vld [vmem:[#allocation3 + $0x4] sm:$0x3] }
 0x2aa   : > { %2808 = vst.msk [vmem:[#allocation3 + $0x8] sm:$0xff] %vm2806_vm6, %v2800_v43  ;;  %v3596_v43 = vld [vmem:[%s4656_s5 + $0x68] sm:$0xf] }
 0x2ad   : > { %v2706_v7 = vpop.f32.mrf.mxu3  ;;  %v2631_v42 = vpop.f32.mrf.mxu2 }
 0x2ae   : > { %v2723_v47 = vadd.f32 %v2706_v7, %v2645_v51  ;;  %v2784_v49 = vpop.f32.mrf.mxu0  ;;  %v2646_v10 = vadd.f32 %v2631_v42, %v2568_v58  ;;  %v2259_v51 = vadd.f32 %v4513_v2, %v4493_v4  ;;  %v2570_v4 = vadd.f32 %v2559_v41, %v2492_v39 }
 0x2b0   : > { %v2801_v55 = vadd.f32 %v2784_v49, %v2723_v47  ;;  %v2337_v47 = vadd.f32 %v4528_v35, %v2259_v51 }
 0x2b1   : > { %v2827_v20 = vld [vmem:[#allocation3 + $0xc] sm:$0x3]  ;;  %v2816_v45 = vld [vmem:[#allocation3 + $0xa] sm:$0x3]  ;;  %v2892_v17 = vld [vmem:[#allocation3 + $0xe] sm:$0x3] }
 0x2b2   : > { %2809 = vst.msk [vmem:[#allocation3 + $0x10] sm:$0xff] %vm2806_vm6, %v2801_v55  ;;  %v2828_v40 = vmax.f32 %v2826_v16, %v2827_v20  ;;  %v2817_v23 = vmax.f32 %v2815_v27, %v2816_v45  ;;  %v2893_v6 = vmax.f32 %v2891_v50, %v2892_v17  ;;  %v2415_v16 = vadd.f32 %v4532_v22, %v2337_v47 }
 0x2b4   : > { %v2830_v29 = vrot.slane %v2828_v40, 1  ;;  %v2819_v18 = vrot.slane %v2817_v23, 1  ;;  %v2895_v52 = vrot.slane %v2893_v6, 1  ;;  %v2493_v36 = vadd.f32 %v4535_v5, %v2415_v16 }
 0x2b5   : > { %v2709_v53 = vpop.f32.mrf.mxu3  ;;  %v2634_v9 = vpop.f32.mrf.mxu2 }
 0x2b6   : > { %v2724_v57 = vadd.f32 %v2709_v53, %v2646_v10  ;;  %v2832_v38 = vmax.f32 %v2828_v40, %v2830_v29  ;;  %v2821_v24 = vmax.f32 %v2817_v23, %v2819_v18  ;;  %v2897_v44 = vmax.f32 %v2893_v6, %v2895_v52  ;;  %v2787_v11 = vpop.f32.mrf.mxu0  ;;  %v2562_v23 = vpop.f32.mrf.mxu1 }
 0x2b7   : > { %v2647_v34 = vadd.f32 %v2634_v9, %v2569_v60  ;;  %v2571_v12 = vadd.f32 %v2562_v23, %v2493_v36 }
 0x2b8   : > { %v2802_v56 = vadd.f32 %v2787_v11, %v2724_v57  ;;  %v2833_v21 = vadd.f32 %v2832_v38, %v4584_v33  ;;  %v2822_v46 = vadd.f32 %v2821_v24, %v4584_v33  ;;  %v2898_v26 = vadd.f32 %v2897_v44, %v4584_v33 }
 0x2b9   : > { %v2930_v49 = vld [vmem:[#allocation3 + $0x14] sm:$0x3]  ;;  %v2969_v40 = vld [vmem:[#allocation3 + $0x16] sm:$0x3] }
 0x2ba   : > { %2810 = vst.msk [vmem:[#allocation3 + $0x18] sm:$0xff] %vm2806_vm6, %v2802_v56  ;;  %v2834_v15 = vmax.f32 %v2833_v21, 0.0  ;;  %v2823_v37 = vmax.f32 %v2822_v46, 0.0  ;;  %v2899_v54 = vmax.f32 %v2898_v26, 0.0 }
 0x2bc   : > { %3576 = vmatmul.msk.f32.vlgmr.msra.gmra.mxu1 %vm2806_vm6, %v2834_v15  ;;  %3578 = vmatmul.msk.f32.vlgmr.msra.gmra.mxu2 %vm2806_vm6, %v2823_v37 }
 0x2bd   : > { %3582 = vmatmul.msk.f32.vlgmr.msra.gmra.mxu3 %vm2806_vm6, %v2899_v54  ;;  %v2712_v63 = vpop.f32.mrf.mxu3  ;;  %3601 = vmatpush.msk.msra.mxu2 %vm2841_vm5, %v3600_v25  ;;  %v2637_v48 = vpop.f32.mrf.mxu2 }
 0x2be   : > { %v2725_v7 = vadd.f32 %v2712_v63, %v2647_v34  ;;  %3605 = vmatpush.msk.msra.mxu3 %vm2841_vm5, %v3604_v31  ;;  %3597 = vmatpush.msk.msra.mxu1 %vm2841_vm5, %v3596_v43  ;;  %v2790_v42 = vpop.f32.mrf.mxu0  ;;  %v2648_v8 = vadd.f32 %v2637_v48, %v2570_v4 }
 0x2bf   : > { %3119 = vmatpush.msra.mxu2 %v3599_v19 }
 0x2c0   : > { %v2803_v13 = vadd.f32 %v2790_v42, %v2725_v7  ;;  %3158 = vmatpush.msra.mxu3 %v3603_v0  ;;  %3080 = vmatpush.msra.mxu1 %v3595_v32 }
 0x2c1   : > { %v2931_v55 = vld [vmem:[#allocation3 + $0x1e] sm:$0x3]  ;;  %v3008_v22 = vld [vmem:[#allocation3 + $0x18] sm:$0x3] }
 0x2c2   : > { %2811 = vst.msk [vmem:[#allocation3 + $0x20] sm:$0xff] %vm2806_vm6, %v2803_v13  ;;  %v2932_v2 = vmax.f32 %v2930_v49, %v2931_v55 }
 0x2c4   : > { %v2934_v27 = vrot.slane %v2932_v2, 1 }
 0x2c5   : > { %v2715_v50 = vpop.f32.mrf.mxu3  ;;  %v2640_v6 = vpop.f32.mrf.mxu2 }
 0x2c6   : > { %v2726_v20 = vadd.f32 %v2715_v50, %v2648_v8  ;;  %v2936_v45 = vmax.f32 %v2932_v2, %v2934_v27  ;;  %v2793_v17 = vpop.f32.mrf.mxu0  ;;  %v2649_v29 = vadd.f32 %v2640_v6, %v2571_v12 }
 0x2c8   : > { %v2804_v35 = vadd.f32 %v2793_v17, %v2726_v20  ;;  %v2937_v58 = vadd.f32 %v2936_v45, %v4584_v33  ;;  %v3164_v45 = vld [vmem:[%s4657_s6] sm:$0x1] }
 0x2c9   : > { %v2970_v59 = vld [vmem:[#allocation3 + $0x20] sm:$0x3]  ;;  %v3009_v14 = vld [vmem:[#allocation3 + $0x22] sm:$0x3] }
 0x2ca   : > { %2812 = vst.msk [vmem:[#allocation3 + $0x28] sm:$0xff] %vm2806_vm6, %v2804_v35  ;;  %v2938_v28 = vmax.f32 %v2937_v58, 0.0  ;;  %v2971_v3 = vmax.f32 %v2969_v40, %v2970_v59  ;;  %v3010_v10 = vmax.f32 %v3008_v22, %v3009_v14  ;;  %v3167_v58 = vld [vmem:[%s4658_s7] sm:$0x1] }
 0x2cb   : > { %v3173_v59 = vld [vmem:[#allocation4] sm:$0x1] }
 0x2cc   : > { %3586 = vmatmul.msk.f32.vlgmr.msrb.gmra.mxu1 %vm2806_vm6, %v2938_v28  ;;  %v2973_v5 = vrot.slane %v2971_v3, 1  ;;  %v3012_v18 = vrot.slane %v3010_v10, 1 }
 0x2cd   : > { %v2718_v52 = vpop.f32.mrf.mxu3 }
 0x2ce   : > { %v2727_v61 = vadd.f32 %v2718_v52, %v2649_v29  ;;  %v2975_v1 = vmax.f32 %v2971_v3, %v2973_v5  ;;  %v3014_v53 = vmax.f32 %v3010_v10, %v3012_v18  ;;  %v2796_v9 = vpop.f32.mrf.mxu0 }
 0x2d0   : > { %v2805_v57 = vadd.f32 %v2796_v9, %v2727_v61  ;;  %v2976_v38 = vadd.f32 %v2975_v1, %v4584_v33  ;;  %v3015_v24 = vadd.f32 %v3014_v53, %v4584_v33 }
 0x2d1   : > { %v3047_v11 = vld [vmem:[#allocation3 + $0x28] sm:$0x3]  ;;  %v3086_v56 = vld [vmem:[#allocation3 + $0x2a] sm:$0x3]  ;;  %v3125_v21 = vld [vmem:[#allocation3 + $0x2c] sm:$0x3] }
 0x2d2   : > { %2813 = vst.msk [vmem:[#allocation3 + $0x30] sm:$0xff] %vm2806_vm6, %v2805_v57  ;;  %v2977_v44 = vmax.f32 %v2976_v38, 0.0  ;;  %v3016_v30 = vmax.f32 %v3015_v24, 0.0 }
 0x2d4   : > { %3590 = vmatmul.msk.f32.vlgmr.msrb.gmra.mxu2 %vm2806_vm6, %v2977_v44  ;;  %3594 = vmatmul.msk.f32.vlgmr.msrb.gmra.mxu3 %vm2806_vm6, %v3016_v30 }
 0x2d9   : > { %v3048_v46 = vld [vmem:[#allocation3 + $0x32] sm:$0x3]  ;;  %v3087_v26 = vld [vmem:[#allocation3 + $0x34] sm:$0x3]  ;;  %v3126_v60 = vld [vmem:[#allocation3 + $0x36] sm:$0x3] }
 0x2da   : > { %v3049_v62 = vmax.f32 %v3047_v11, %v3048_v46  ;;  %v3088_v15 = vmax.f32 %v3086_v56, %v3087_v26  ;;  %v3127_v37 = vmax.f32 %v3125_v21, %v3126_v60 }
 0x2dc   : > { %v3051_v54 = vrot.slane %v3049_v62, 1  ;;  %v3090_v25 = vrot.slane %v3088_v15, 1  ;;  %v3129_v31 = vrot.slane %v3127_v37, 1 }
 0x2de   : > { %v3053_v43 = vmax.f32 %v3049_v62, %v3051_v54  ;;  %v3092_v34 = vmax.f32 %v3088_v15, %v3090_v25  ;;  %v3131_v19 = vmax.f32 %v3127_v37, %v3129_v31 }
 0x2e0   : > { %v3054_v63 = vadd.f32 %v3053_v43, %v4584_v33  ;;  %v3093_v0 = vadd.f32 %v3092_v34, %v4584_v33  ;;  %v3132_v32 = vadd.f32 %v3131_v19, %v4584_v33 }
 0x2e2   : > { %v3055_v41 = vmax.f32 %v3054_v63, 0.0  ;;  %v3094_v51 = vmax.f32 %v3093_v0, 0.0  ;;  %v3133_v39 = vmax.f32 %v3132_v32, 0.0 }
 0x2e4   : > { %3598 = vmatmul.msk.f32.vlgmr.msra.gmra.mxu1 %vm2806_vm6, %v3055_v41  ;;  %3602 = vmatmul.msk.f32.vlgmr.msra.gmra.mxu2 %vm2806_vm6, %v3094_v51 }
 0x2e5   : > { %3606 = vmatmul.msk.f32.vlgmr.msra.gmra.mxu3 %vm2806_vm6, %v3133_v39 }
 0x339   : > { %v2862_v7 = vpop.f32.mrf.mxu1 }
 0x33f   : > { %v2888_v48 = vpop.f32.mrf.mxu2 }
 0x340   : > { %v2889_v42 = vadd.f32 %v2888_v48, %v2862_v7  ;;  %v2926_v47 = vpop.f32.mrf.mxu3 }
 0x342   : > { %v2929_v49 = vadd.f32 %v2926_v47, %v2889_v42 }
 0x349   : > { %v2965_v13 = vpop.f32.mrf.mxu1 }
 0x34a   : > { %v2968_v16 = vadd.f32 %v2965_v13, %v2929_v49 }
 0x357   : > { %v3004_v55 = vpop.f32.mrf.mxu2  ;;  %v3043_v2 = vpop.f32.mrf.mxu3 }
 0x358   : > { %v3007_v4 = vadd.f32 %v3004_v55, %v2968_v16 }
 0x35a   : > { %v3046_v8 = vadd.f32 %v3043_v2, %v3007_v4 }
 0x361   : > { %v3082_v33 = vpop.f32.mrf.mxu1 }
 0x362   : > { %v3085_v27 = vadd.f32 %v3082_v33, %v3046_v8 }
 0x367   : > { %v3121_v50 = vpop.f32.mrf.mxu2 }
 0x368   : > { %v3124_v36 = vadd.f32 %v3121_v50, %v3085_v27  ;;  %v3160_v20 = vpop.f32.mrf.mxu3 }
 0x36a   : > { %v3163_v17 = vadd.f32 %v3160_v20, %v3124_v36 }
 0x36c   : > { %v3165_v35 = vadd.f32 %v3164_v45, %v3163_v17 }
 0x36e   : > { %v3166_v40 = vmax.f32 %v3165_v35, 0.0 }
 0x370   : > { %v3168_v23 = vmul.f32 %v3167_v58, %v3166_v40 }
 0x372   : > { %v3170_v6 = vsel %vm3169_vm7, %v3168_v23, 0.0 }
 0x373   : > { %3171 = vadd.xlane.f32.xlu0 %v3170_v6 }
 0x3e6   : > { %v3172_v22 = vpop.xlane.xlu0 %3171 }
 0x3e7   : > { %v3174_v14 = vadd.f32 %v3173_v59, %v3172_v22 }
 0x3e9   : > { %v3175_v12 = vand.u32 2147483647, %v3174_v14  ;;  %vm3179_vm13 = vcmp.ge.f32.partialorder %v3174_v14, 0.0 }
 0x3eb   : > { %v3176_v28 = vsub.f32 0.0, %v3175_v12 }
 0x3ed   : > { %v3177_v3 = vmul.f32 1.442695, %v3176_v28 }
 0x3ef   : > { %3631 = vpow2.f32 %v3177_v3 }
 0x3f5   : > { %v3632_v10 = vpop.eup %3631 }
 0x3f6   : > { %v3180_v29 = vadd.f32 1.0, %v3632_v10 }
 0x3f8   : > { %3633 = vrcp.f32 %v3180_v29  ;;  %v3192_v61 = vand.u32 2147483648, %v3180_v29  ;;  %v3190_v53 = vand.u32 2147483647, %v3180_v29  ;;  %vm3186_vm9 = vweird.f32 %v3180_v29 }
 0x3fa   : > { %v3193_v57 = vor.u32 1.1754944e-38, %v3192_v61  ;;  %vm3191_vm11 = vcmp.eq.f32.partialorder %v3190_v53, 8.507059e+37 }
 0x3fe   : > { %v3634_v5 = vpop.eup %3633 }
 0x3ff   : > { %v3182_v18 = vmul.f32 %v3634_v5, %v3180_v29  ;;  %vm3187_vm8 = vweird.f32 %v3634_v5 }
 0x400   : > { %vm3188_vm10 = vmor %vm3186_vm9, %vm3187_vm8 }
 0x401   : > { %v3183_v52 = vsub.f32 1.0, %v3182_v18 }
 0x403   : > { %v3184_v1 = vmul.f32 %v3634_v5, %v3183_v52 }
 0x405   : > { %v3185_v9 = vadd.f32 %v3634_v5, %v3184_v1 }
 0x407   : > { %v3189_v38 = vsel %vm3188_vm10, %v3634_v5, %v3185_v9 }
 0x408   : > { %v3194_v24 = vsel %vm3191_vm11, %v3193_v57, %v3189_v38 }
 0x409   : > { %v3196_v44 = vmul.f32 %v3632_v10, %v3194_v24 }
 0x40b   : > { %v3197_v30 = vsel %vm3179_vm13, %v3194_v24, %v3196_v44 }
 0x40c   : > { %3199 = vst.msk [vmem:[%s335_s14] sm:$0x1] %vm3198_vm12, %v3197_v30 }
 0x40d PF: > { %s21_s11 = sadd.s32 1, %s3641_s11  }
 0x40e   : > { %p18_p5 = scmp.ge.s32.totalorder %s21_s11, 4  }
 0x410   :  { %20 = sbr.rel (!%p18_p5) target bundleno = 3 (0x3), region = 121 }

</bundles_post_ra>
